<compile_context>
chip_gen: v5e
topology: v5e:2x2
jax: 0.10.0
libtpu: 0.0.40
codegen_flags: <defaults>
</compile_context>

<pallas_src>
import math

import jax
import jax.numpy as jnp
from jax.experimental import pallas as pl
from jax.experimental.pallas import tpu as pltpu

_F32 = jnp.float32
_BF16 = jnp.bfloat16


# ----------------------------- kernel helpers -----------------------------

def _layer_norm(t, eps=1e-6):
    # nn.LayerNorm(elementwise_affine=False, eps=1e-6): biased variance over last dim.
    mu = jnp.mean(t, axis=-1, keepdims=True)
    d = t - mu
    var = jnp.mean(d * d, axis=-1, keepdims=True)
    return d * jax.lax.rsqrt(var + eps)


def _gelu_exact(x):
    # GELU(x) = 0.5 * x * (1 + erf(x / sqrt(2)))  (PyTorch nn.GELU default, exact form).
    # erf via Abramowitz & Stegun 7.1.26 (|err| < 1.5e-7): uses only exp/mul/add/div/
    # select, so it lowers on Mosaic without relying on an erf primitive.
    z = x * 0.7071067811865476
    a = jnp.abs(z)
    t = 1.0 / (1.0 + 0.3275911 * a)
    poly = t * (0.254829592 + t * (-0.284496736 + t * (1.421413741
                + t * (-1.453152027 + t * 1.061405429))))
    erf_abs = 1.0 - poly * jnp.exp(-(a * a))
    erf = jnp.where(z >= 0.0, erf_abs, -erf_abs)
    return 0.5 * x * (1.0 + erf)


def _make_kernel(num_heads, head_dim, has_x_mask, has_mem_mask):
    H, hd = num_heads, head_dim

    def split_heads(t2):
        # (n, H*hd) f32 -> (H, n, hd): static lane slices + stack == the head-split
        # transpose as an explicit, guaranteed-to-lower copy (cheap vs. the GEMMs).
        return jnp.stack([t2[:, h * hd:(h + 1) * hd] for h in range(H)], axis=0)

    def merge_heads(t3):
        # (H, n, hd) -> (n, H*hd)
        return jnp.concatenate([t3[h] for h in range(H)], axis=-1)

    def attention(q_in, kv_in, wq, bq, wk, bk, wv, bv, wp, bp, mask):
        # Full-width projections: (m, D) @ (D, D), bf16 MXU inputs, f32 accumulation.
        # The 1/sqrt(hd) softmax scale is pre-folded into wq/bq in the wrapper.
        q2 = jnp.dot(q_in.astype(_BF16), wq[...], preferred_element_type=_F32) + bq[...]
        k2 = jnp.dot(kv_in.astype(_BF16), wk[...], preferred_element_type=_F32) + bk[...]
        v2 = jnp.dot(kv_in.astype(_BF16), wv[...], preferred_element_type=_F32) + bv[...]

        q3 = split_heads(q2).astype(_BF16)        # (H, n_q,  hd)
        k3 = split_heads(k2).astype(_BF16)        # (H, n_kv, hd)
        v3 = split_heads(v2).astype(_BF16)        # (H, n_kv, hd)

        # Heads-batched attention core (leading batch dim == flash reference form).
        dn_qk = (((2,), (2,)), ((0,), (0,)))      # contract head_dim
        dn_pv = (((2,), (1,)), ((0,), (0,)))      # contract n_kv
        s = jax.lax.dot_general(q3, k3, dn_qk, preferred_element_type=_F32)  # (H,nq,nkv)
        if mask is not None:
            s = s + mask[None]
        s = s - jnp.max(s, axis=-1, keepdims=True)
        p = jnp.exp(s)
        p = p * pl.reciprocal(jnp.sum(p, axis=-1, keepdims=True), approx=True)
        o3 = jax.lax.dot_general(p.astype(_BF16), v3, dn_pv,
                                 preferred_element_type=_F32)                 # (H,nq,hd)

        # Concat-heads output projection: a single (m, D) @ (D, D) GEMM.
        o2 = merge_heads(o3).astype(_BF16)                                    # (nq, D)
        return jnp.dot(o2, wp[...], preferred_element_type=_F32) + bp[...]

    def kernel(*refs):
        it = iter(refs)
        x_ref, mem_ref = next(it), next(it)
        xm_ref = next(it) if has_x_mask else None
        mm_ref = next(it) if has_mem_mask else None
        (wq1, bq1, wk1, bk1, wv1, bv1, wp1, bp1,
         wq2, bq2, wk2, bk2, wv2, bv2, wp2, bp2,
         w1, b1, w2, b2, o_ref) = tuple(it)

        x2 = x_ref[...].astype(_F32)          # (n_q,  D)
        mem2 = mem_ref[...].astype(_F32)      # (n_kv, D)
        xm = xm_ref[...].astype(_F32) if has_x_mask else None
        mm = mm_ref[...].astype(_F32) if has_mem_mask else None

        # x = norm1(x); x = x + self_attn(x, x, x, x_mask)
        h = _layer_norm(x2)
        h = h + attention(h, h, wq1, bq1, wk1, bk1, wv1, bv1, wp1, bp1, xm)

        # x = norm2(x); x = x + cross_attn(x, mem, mem, mem_mask)
        h = _layer_norm(h)
        h = h + attention(h, mem2, wq2, bq2, wk2, bk2, wv2, bv2, wp2, bp2, mm)

        # x = x + mlp(norm3(x))   (fc1 -> GELU(exact) -> fc2; dropout p=0 is identity)
        n3 = _layer_norm(h)
        hid = jnp.dot(n3.astype(_BF16), w1[...], preferred_element_type=_F32) + b1[...]
        hid = _gelu_exact(hid).astype(_BF16)   # keep the 4D-wide hidden in bf16 for fc2
        out = jnp.dot(hid, w2[...], preferred_element_type=_F32) + b2[...]

        o_ref[...] = (h + out).astype(o_ref.dtype)

    return kernel


# ------------------------------- wrapper ------------------------------------

def transformer_decoder_block(x, mem, x_mask, mem_mask, params, *, num_heads):
    B, n_q, D = x.shape
    _, n_kv, _ = mem.shape
    assert D % num_heads == 0
    hd = D // num_heads
    scale = 1.0 / math.sqrt(hd)
    has_x_mask = x_mask is not None
    has_mem_mask = mem_mask is not None

    # Trace-time weight prep (runs in XLA, outside the kernel): fold the softmax scale
    # into wq/bq, cast GEMM weights to bf16 (MXU native), keep biases f32.  Weights stay
    # plain (D, D)/(D, 4D) matrices so every in-kernel projection is a full-width GEMM.
    def prep_w(w):
        return jnp.asarray(w, _F32).astype(_BF16)

    def prep_b(b, n):
        return jnp.asarray(b, _F32).reshape(1, n)

    weights = []
    for pre in ("1", "2"):        # 1 = self-attn, 2 = cross-attn
        weights += [
            prep_w(params[f"wq{pre}"] * scale), prep_b(params[f"bq{pre}"] * scale, D),
            prep_w(params[f"wk{pre}"]),         prep_b(params[f"bk{pre}"], D),
            prep_w(params[f"wv{pre}"]),         prep_b(params[f"bv{pre}"], D),
            prep_w(params[f"wp{pre}"]),         prep_b(params[f"bp{pre}"], D),
        ]
    Dh = params["w1"].shape[1]
    weights += [prep_w(params["w1"]), prep_b(params["b1"], Dh),
                prep_w(params["w2"]), prep_b(params["b2"], D)]

    # One batch element per grid step: attention never mixes batches, and the grid has
    # >= 2 "parallel" steps -> input/output DMA is pipelined and both v7x TCs get work.
    n_steps = B

    def const_spec(shape):
        nd = len(shape)
        idx = lambda b, _nd=nd: (0,) * _nd
        if n_steps > 1:
            # Constants are revisited every step (block index always 0) -> single-buffer.
            return pl.BlockSpec(shape, idx, pipeline_mode=pl.Buffered(1))
        return pl.BlockSpec(shape, idx)

    operands = [x, mem]
    in_specs = [pl.BlockSpec((None, n_q, D), lambda b: (b, 0, 0)),
                pl.BlockSpec((None, n_kv, D), lambda b: (b, 0, 0))]
    if has_x_mask:
        operands.append(jnp.asarray(x_mask, _F32))
        in_specs.append(const_spec((n_q, n_q)))
    if has_mem_mask:
        operands.append(jnp.asarray(mem_mask, _F32))
        in_specs.append(const_spec((n_q, n_kv)))
    operands += weights
    in_specs += [const_spec(tuple(w.shape)) for w in weights]

    # Scoped-VMEM limit from actual buffer sizes (constants single-buffered, x/mem/out
    # double-buffered, f32 intermediates), ~2x headroom, capped at 64 MiB so the same
    # value is legal on v7x (64 MiB physical) as well as v5e/v6e (128 MiB).
    const_bytes = sum(int(w.size) * w.dtype.itemsize for w in operands[2:])
    io_bytes = 2 * 4 * (2 * n_q * D + n_kv * D)
    act_bytes = 4 * (10 * n_q * D + 4 * n_kv * D
                     + 2 * num_heads * n_q * max(n_q, n_kv) + 2 * n_q * Dh)
    vmem_limit = int(min(64 << 20, max(32 << 20, 2 * (const_bytes + io_bytes + act_bytes))))

    kernel = _make_kernel(num_heads, hd, has_x_mask, has_mem_mask)
    return pl.pallas_call(
        kernel,
        out_shape=jax.ShapeDtypeStruct((B, n_q, D), x.dtype),
        grid_spec=pltpu.PrefetchScalarGridSpec(
            num_scalar_prefetch=0,
            grid=(n_steps,),
            in_specs=in_specs,
            out_specs=pl.BlockSpec((None, n_q, D), lambda b: (b, 0, 0)),
        ),
        compiler_params=pltpu.CompilerParams(
            dimension_semantics=("parallel",),
            vmem_limit_bytes=vmem_limit),
    )(*operands)


# --------------------------- pure-JAX reference ------------------------------

def _ref_layer_norm(t, eps=1e-6):
    mu = jnp.mean(t, axis=-1, keepdims=True)
    var = jnp.mean((t - mu) ** 2, axis=-1, keepdims=True)
    return (t - mu) / jnp.sqrt(var + eps)


def _ref_mha(qx, kvx, p, prefix, mask, num_heads):
    B, Nq, D = qx.shape
    Nkv = kvx.shape[1]
    hd = D // num_heads
    q = qx @ p[f"wq{prefix}"] + p[f"bq{prefix}"]
    k = kvx @ p[f"wk{prefix}"] + p[f"bk{prefix}"]
    v = kvx @ p[f"wv{prefix}"] + p[f"bv{prefix}"]
    q = q.reshape(B, Nq, num_heads, hd).transpose(0, 2, 1, 3)
    k = k.reshape(B, Nkv, num_heads, hd).transpose(0, 2, 1, 3)
    v = v.reshape(B, Nkv, num_heads, hd).transpose(0, 2, 1, 3)
    s = jnp.einsum("bhqd,bhkd->bhqk", q, k) / math.sqrt(hd)
    if mask is not None:
        s = s + mask[None, None]
    a = jax.nn.softmax(s, axis=-1)
    o = jnp.einsum("bhqk,bhkd->bhqd", a, v)
    o = o.transpose(0, 2, 1, 3).reshape(B, Nq, D)
    return o @ p[f"wp{prefix}"] + p[f"bp{prefix}"]


def decoder_block_ref(x, mem, x_mask, mem_mask, p, *, num_heads):
    h = _ref_layer_norm(x)
    h = h + _ref_mha(h, h, p, "1", x_mask, num_heads)
    h = _ref_layer_norm(h)
    h = h + _ref_mha(h, mem, p, "2", mem_mask, num_heads)
    n3 = _ref_layer_norm(h)
    hid = jax.nn.gelu(n3 @ p["w1"] + p["b1"], approximate=False)
    return h + (hid @ p["w2"] + p["b2"])


# --------------------------------- main --------------------------------------

if __name__ == "__main__":
    B, Nq, Nkv = 2, 8, 16
    hidden_size, num_heads, mlp_ratio = 32, 4, 4
    Dh = hidden_size * mlp_ratio

    key = jax.random.PRNGKey(0)
    keys = jax.random.split(key, 40)
    ki = iter(keys)

    def w(shape, s=0.02):
        return jax.random.normal(next(ki), shape, jnp.float32) * s

    params = {}
    for prefix in ("1", "2"):  # 1 = self-attn, 2 = cross-attn
        for name in ("q", "k", "v", "p"):
            params[f"w{name}{prefix}"] = w((hidden_size, hidden_size))
            params[f"b{name}{prefix}"] = w((1, hidden_size))
    params["w1"] = w((hidden_size, Dh))
    params["b1"] = w((1, Dh))
    params["w2"] = w((Dh, hidden_size))
    params["b2"] = w((1, hidden_size))

    x = jax.random.normal(next(ki), (B, Nq, hidden_size), jnp.float32)
    mem = jax.random.normal(next(ki), (B, Nkv, hidden_size), jnp.float32)

    # Additive float masks (what F.scaled_dot_product_attention accepts):
    # causal for self-attention, random key-padding-ish for cross-attention.
    neg = jnp.float32(-1e9)
    x_mask = jnp.where(jnp.tril(jnp.ones((Nq, Nq), bool)), 0.0, neg).astype(jnp.float32)
    keep = jax.random.bernoulli(next(ki), 0.8, (Nq, Nkv))
    keep = keep.at[:, 0].set(True)   # guarantee no fully-masked row (softmax NaN)
    mem_mask = jnp.where(keep, 0.0, neg).astype(jnp.float32)

    out = transformer_decoder_block(x, mem, x_mask, mem_mask, params,
                                    num_heads=num_heads)
    out = jax.block_until_ready(out)

    ref = decoder_block_ref(x, mem, x_mask, mem_mask, params, num_heads=num_heads)
    assert out.shape == (B, Nq, hidden_size)
    err = float(jnp.max(jnp.abs(out - ref)))
    # bf16 MXU inputs + approx EUP reciprocal -> slightly looser tolerance than pure f32.
    assert jnp.allclose(out, ref, rtol=2e-2, atol=2e-2), err

    print("KERNEL_OK")
</pallas_src>

<mosaic_0001>
module attributes {stable_mosaic.version = 11 : i64} {
  func.func @kernel(%arg0: i32, %arg1: memref<1x8x32xf32, #tpu.memory_space<vmem>>, %arg2: memref<1x16x32xf32, #tpu.memory_space<vmem>>, %arg3: memref<8x8xf32, #tpu.memory_space<vmem>>, %arg4: memref<8x16xf32, #tpu.memory_space<vmem>>, %arg5: memref<32x32xbf16, #tpu.memory_space<vmem>>, %arg6: memref<1x32xf32, #tpu.memory_space<vmem>>, %arg7: memref<32x32xbf16, #tpu.memory_space<vmem>>, %arg8: memref<1x32xf32, #tpu.memory_space<vmem>>, %arg9: memref<32x32xbf16, #tpu.memory_space<vmem>>, %arg10: memref<1x32xf32, #tpu.memory_space<vmem>>, %arg11: memref<32x32xbf16, #tpu.memory_space<vmem>>, %arg12: memref<1x32xf32, #tpu.memory_space<vmem>>, %arg13: memref<32x32xbf16, #tpu.memory_space<vmem>>, %arg14: memref<1x32xf32, #tpu.memory_space<vmem>>, %arg15: memref<32x32xbf16, #tpu.memory_space<vmem>>, %arg16: memref<1x32xf32, #tpu.memory_space<vmem>>, %arg17: memref<32x32xbf16, #tpu.memory_space<vmem>>, %arg18: memref<1x32xf32, #tpu.memory_space<vmem>>, %arg19: memref<32x32xbf16, #tpu.memory_space<vmem>>, %arg20: memref<1x32xf32, #tpu.memory_space<vmem>>, %arg21: memref<32x128xbf16, #tpu.memory_space<vmem>>, %arg22: memref<1x128xf32, #tpu.memory_space<vmem>>, %arg23: memref<128x32xbf16, #tpu.memory_space<vmem>>, %arg24: memref<1x32xf32, #tpu.memory_space<vmem>>, %arg25: memref<1x8x32xf32, #tpu.memory_space<vmem>>) attributes {dimension_semantics = [#tpu.dimension_semantics<parallel>], iteration_bounds = array<i64: 2>, scalar_prefetch = 0 : i64, scratch_operands = 0 : i64, tpu.core_type = #tpu.core_type<tc>, window_params = [{transform_indices = @transform_0, window_bounds = array<i64: 1, 8, 32>}, {transform_indices = @transform_1, window_bounds = array<i64: 1, 16, 32>}, {pipeline_mode = #tpu.pipeline_mode<synchronous>, transform_indices = @transform_2, window_bounds = array<i64: 8, 8>}, {pipeline_mode = #tpu.pipeline_mode<synchronous>, transform_indices = @transform_3, window_bounds = array<i64: 8, 16>}, {pipeline_mode = #tpu.pipeline_mode<synchronous>, transform_indices = @transform_4, window_bounds = array<i64: 32, 32>}, {pipeline_mode = #tpu.pipeline_mode<synchronous>, transform_indices = @transform_5, window_bounds = array<i64: 1, 32>}, {pipeline_mode = #tpu.pipeline_mode<synchronous>, transform_indices = @transform_6, window_bounds = array<i64: 32, 32>}, {pipeline_mode = #tpu.pipeline_mode<synchronous>, transform_indices = @transform_7, window_bounds = array<i64: 1, 32>}, {pipeline_mode = #tpu.pipeline_mode<synchronous>, transform_indices = @transform_8, window_bounds = array<i64: 32, 32>}, {pipeline_mode = #tpu.pipeline_mode<synchronous>, transform_indices = @transform_9, window_bounds = array<i64: 1, 32>}, {pipeline_mode = #tpu.pipeline_mode<synchronous>, transform_indices = @transform_10, window_bounds = array<i64: 32, 32>}, {pipeline_mode = #tpu.pipeline_mode<synchronous>, transform_indices = @transform_11, window_bounds = array<i64: 1, 32>}, {pipeline_mode = #tpu.pipeline_mode<synchronous>, transform_indices = @transform_12, window_bounds = array<i64: 32, 32>}, {pipeline_mode = #tpu.pipeline_mode<synchronous>, transform_indices = @transform_13, window_bounds = array<i64: 1, 32>}, {pipeline_mode = #tpu.pipeline_mode<synchronous>, transform_indices = @transform_14, window_bounds = array<i64: 32, 32>}, {pipeline_mode = #tpu.pipeline_mode<synchronous>, transform_indices = @transform_15, window_bounds = array<i64: 1, 32>}, {pipeline_mode = #tpu.pipeline_mode<synchronous>, transform_indices = @transform_16, window_bounds = array<i64: 32, 32>}, {pipeline_mode = #tpu.pipeline_mode<synchronous>, transform_indices = @transform_17, window_bounds = array<i64: 1, 32>}, {pipeline_mode = #tpu.pipeline_mode<synchronous>, transform_indices = @transform_18, window_bounds = array<i64: 32, 32>}, {pipeline_mode = #tpu.pipeline_mode<synchronous>, transform_indices = @transform_19, window_bounds = array<i64: 1, 32>}, {pipeline_mode = #tpu.pipeline_mode<synchronous>, transform_indices = @transform_20, window_bounds = array<i64: 32, 128>}, {pipeline_mode = #tpu.pipeline_mode<synchronous>, transform_indices = @transform_21, window_bounds = array<i64: 1, 128>}, {pipeline_mode = #tpu.pipeline_mode<synchronous>, transform_indices = @transform_22, window_bounds = array<i64: 128, 32>}, {pipeline_mode = #tpu.pipeline_mode<synchronous>, transform_indices = @transform_23, window_bounds = array<i64: 1, 32>}, {transform_indices = @transform_24, window_bounds = array<i64: 1, 8, 32>}]} {
    %c0 = arith.constant 0 : index
    %c0_0 = arith.constant 0 : index
    %c0_1 = arith.constant 0 : index
    %0 = vector.load %arg1[%c0, %c0_0, %c0_1] : memref<1x8x32xf32, #tpu.memory_space<vmem>>, vector<1x8x32xf32>
    %1 = vector.shape_cast %0 : vector<1x8x32xf32> to vector<8x32xf32>
    %c0_2 = arith.constant 0 : index
    %c0_3 = arith.constant 0 : index
    %c0_4 = arith.constant 0 : index
    %2 = vector.load %arg2[%c0_2, %c0_3, %c0_4] : memref<1x16x32xf32, #tpu.memory_space<vmem>>, vector<1x16x32xf32>
    %3 = vector.shape_cast %2 : vector<1x16x32xf32> to vector<16x32xf32>
    %c0_5 = arith.constant 0 : index
    %c0_6 = arith.constant 0 : index
    %4 = vector.load %arg3[%c0_5, %c0_6] : memref<8x8xf32, #tpu.memory_space<vmem>>, vector<8x8xf32>
    %c0_7 = arith.constant 0 : index
    %c0_8 = arith.constant 0 : index
    %5 = vector.load %arg4[%c0_7, %c0_8] : memref<8x16xf32, #tpu.memory_space<vmem>>, vector<8x16xf32>
    %cst = arith.constant dense<0.000000e+00> : vector<8xf32>
    %6 = vector.multi_reduction <add>, %1, %cst [1] : vector<8x32xf32> to vector<8xf32>
    %7 = vector.shape_cast %6 : vector<8xf32> to vector<8x1xf32>
    %cst_9 = arith.constant 3.200000e+01 : f32
    %8 = vector.broadcast %cst_9 : f32 to vector<8x1xf32>
    %9 = arith.divf %7, %8 : vector<8x1xf32>
    %10 = vector.broadcast %9 : vector<8x1xf32> to vector<8x32xf32>
    %11 = arith.subf %1, %10 : vector<8x32xf32>
    %12 = arith.mulf %11, %11 : vector<8x32xf32>
    %cst_10 = arith.constant dense<0.000000e+00> : vector<8xf32>
    %13 = vector.multi_reduction <add>, %12, %cst_10 [1] : vector<8x32xf32> to vector<8xf32>
    %14 = vector.shape_cast %13 : vector<8xf32> to vector<8x1xf32>
    %cst_11 = arith.constant 3.200000e+01 : f32
    %15 = vector.broadcast %cst_11 : f32 to vector<8x1xf32>
    %16 = arith.divf %14, %15 : vector<8x1xf32>
    %cst_12 = arith.constant 9.99999997E-7 : f32
    %17 = vector.broadcast %cst_12 : f32 to vector<8x1xf32>
    %18 = arith.addf %16, %17 : vector<8x1xf32>
    %19 = math.rsqrt %18 : vector<8x1xf32>
    %20 = vector.broadcast %19 : vector<8x1xf32> to vector<8x32xf32>
    %21 = arith.mulf %11, %20 : vector<8x32xf32>
    %22 = arith.truncf %21 : vector<8x32xf32> to vector<8x32xbf16>
    %c0_13 = arith.constant 0 : index
    %c0_14 = arith.constant 0 : index
    %23 = vector.load %arg5[%c0_13, %c0_14] : memref<32x32xbf16, #tpu.memory_space<vmem>>, vector<32x32xbf16>
    %cst_15 = arith.constant dense<0.000000e+00> : vector<8x32xf32>
    %24 = tpu.matmul %22, %23, %cst_15 {dimension_numbers = #tpu.dot_dimension_numbers<[1], [0], [0], [1], [0, 0, 1, 1], [], []>} : vector<8x32xbf16>, vector<32x32xbf16>, vector<8x32xf32> -> vector<8x32xf32>
    %c0_16 = arith.constant 0 : index
    %c0_17 = arith.constant 0 : index
    %25 = vector.load %arg6[%c0_16, %c0_17] : memref<1x32xf32, #tpu.memory_space<vmem>>, vector<1x32xf32>
    %26 = vector.broadcast %25 : vector<1x32xf32> to vector<8x32xf32>
    %27 = arith.addf %24, %26 : vector<8x32xf32>
    %28 = arith.truncf %21 : vector<8x32xf32> to vector<8x32xbf16>
    %c0_18 = arith.constant 0 : index
    %c0_19 = arith.constant 0 : index
    %29 = vector.load %arg7[%c0_18, %c0_19] : memref<32x32xbf16, #tpu.memory_space<vmem>>, vector<32x32xbf16>
    %cst_20 = arith.constant dense<0.000000e+00> : vector<8x32xf32>
    %30 = tpu.matmul %28, %29, %cst_20 {dimension_numbers = #tpu.dot_dimension_numbers<[1], [0], [0], [1], [0, 0, 1, 1], [], []>} : vector<8x32xbf16>, vector<32x32xbf16>, vector<8x32xf32> -> vector<8x32xf32>
    %c0_21 = arith.constant 0 : index
    %c0_22 = arith.constant 0 : index
    %31 = vector.load %arg8[%c0_21, %c0_22] : memref<1x32xf32, #tpu.memory_space<vmem>>, vector<1x32xf32>
    %32 = vector.broadcast %31 : vector<1x32xf32> to vector<8x32xf32>
    %33 = arith.addf %30, %32 : vector<8x32xf32>
    %34 = arith.truncf %21 : vector<8x32xf32> to vector<8x32xbf16>
    %c0_23 = arith.constant 0 : index
    %c0_24 = arith.constant 0 : index
    %35 = vector.load %arg9[%c0_23, %c0_24] : memref<32x32xbf16, #tpu.memory_space<vmem>>, vector<32x32xbf16>
    %cst_25 = arith.constant dense<0.000000e+00> : vector<8x32xf32>
    %36 = tpu.matmul %34, %35, %cst_25 {dimension_numbers = #tpu.dot_dimension_numbers<[1], [0], [0], [1], [0, 0, 1, 1], [], []>} : vector<8x32xbf16>, vector<32x32xbf16>, vector<8x32xf32> -> vector<8x32xf32>
    %c0_26 = arith.constant 0 : index
    %c0_27 = arith.constant 0 : index
    %37 = vector.load %arg10[%c0_26, %c0_27] : memref<1x32xf32, #tpu.memory_space<vmem>>, vector<1x32xf32>
    %38 = vector.broadcast %37 : vector<1x32xf32> to vector<8x32xf32>
    %39 = arith.addf %36, %38 : vector<8x32xf32>
    %40 = vector.extract_strided_slice %27 {offsets = [0, 0], sizes = [8, 8], strides = [1, 1]} : vector<8x32xf32> to vector<8x8xf32>
    %41 = vector.extract_strided_slice %27 {offsets = [0, 8], sizes = [8, 8], strides = [1, 1]} : vector<8x32xf32> to vector<8x8xf32>
    %42 = vector.extract_strided_slice %27 {offsets = [0, 16], sizes = [8, 8], strides = [1, 1]} : vector<8x32xf32> to vector<8x8xf32>
    %43 = vector.extract_strided_slice %27 {offsets = [0, 24], sizes = [8, 8], strides = [1, 1]} : vector<8x32xf32> to vector<8x8xf32>
    %44 = vector.shape_cast %40 : vector<8x8xf32> to vector<1x8x8xf32>
    %45 = vector.shape_cast %41 : vector<8x8xf32> to vector<1x8x8xf32>
    %46 = vector.shape_cast %42 : vector<8x8xf32> to vector<1x8x8xf32>
    %47 = vector.shape_cast %43 : vector<8x8xf32> to vector<1x8x8xf32>
    %48 = tpu.concatenate %44, %45, %46, %47 in 0 : vector<1x8x8xf32>, vector<1x8x8xf32>, vector<1x8x8xf32>, vector<1x8x8xf32> -> vector<4x8x8xf32>
    %49 = arith.truncf %48 : vector<4x8x8xf32> to vector<4x8x8xbf16>
    %50 = vector.extract_strided_slice %33 {offsets = [0, 0], sizes = [8, 8], strides = [1, 1]} : vector<8x32xf32> to vector<8x8xf32>
    %51 = vector.extract_strided_slice %33 {offsets = [0, 8], sizes = [8, 8], strides = [1, 1]} : vector<8x32xf32> to vector<8x8xf32>
    %52 = vector.extract_strided_slice %33 {offsets = [0, 16], sizes = [8, 8], strides = [1, 1]} : vector<8x32xf32> to vector<8x8xf32>
    %53 = vector.extract_strided_slice %33 {offsets = [0, 24], sizes = [8, 8], strides = [1, 1]} : vector<8x32xf32> to vector<8x8xf32>
    %54 = vector.shape_cast %50 : vector<8x8xf32> to vector<1x8x8xf32>
    %55 = vector.shape_cast %51 : vector<8x8xf32> to vector<1x8x8xf32>
    %56 = vector.shape_cast %52 : vector<8x8xf32> to vector<1x8x8xf32>
    %57 = vector.shape_cast %53 : vector<8x8xf32> to vector<1x8x8xf32>
    %58 = tpu.concatenate %54, %55, %56, %57 in 0 : vector<1x8x8xf32>, vector<1x8x8xf32>, vector<1x8x8xf32>, vector<1x8x8xf32> -> vector<4x8x8xf32>
    %59 = arith.truncf %58 : vector<4x8x8xf32> to vector<4x8x8xbf16>
    %60 = vector.extract_strided_slice %39 {offsets = [0, 0], sizes = [8, 8], strides = [1, 1]} : vector<8x32xf32> to vector<8x8xf32>
    %61 = vector.extract_strided_slice %39 {offsets = [0, 8], sizes = [8, 8], strides = [1, 1]} : vector<8x32xf32> to vector<8x8xf32>
    %62 = vector.extract_strided_slice %39 {offsets = [0, 16], sizes = [8, 8], strides = [1, 1]} : vector<8x32xf32> to vector<8x8xf32>
    %63 = vector.extract_strided_slice %39 {offsets = [0, 24], sizes = [8, 8], strides = [1, 1]} : vector<8x32xf32> to vector<8x8xf32>
    %64 = vector.shape_cast %60 : vector<8x8xf32> to vector<1x8x8xf32>
    %65 = vector.shape_cast %61 : vector<8x8xf32> to vector<1x8x8xf32>
    %66 = vector.shape_cast %62 : vector<8x8xf32> to vector<1x8x8xf32>
    %67 = vector.shape_cast %63 : vector<8x8xf32> to vector<1x8x8xf32>
    %68 = tpu.concatenate %64, %65, %66, %67 in 0 : vector<1x8x8xf32>, vector<1x8x8xf32>, vector<1x8x8xf32>, vector<1x8x8xf32> -> vector<4x8x8xf32>
    %69 = arith.truncf %68 : vector<4x8x8xf32> to vector<4x8x8xbf16>
    %cst_28 = arith.constant dense<0.000000e+00> : vector<4x8x8xf32>
    %70 = tpu.matmul %49, %59, %cst_28 {dimension_numbers = #tpu.dot_dimension_numbers<[2], [2], [1], [1], [0, 0, 0, 1, 1, 1], [0], [0]>} : vector<4x8x8xbf16>, vector<4x8x8xbf16>, vector<4x8x8xf32> -> vector<4x8x8xf32>
    %71 = vector.shape_cast %4 : vector<8x8xf32> to vector<1x8x8xf32>
    %72 = vector.broadcast %71 : vector<1x8x8xf32> to vector<4x8x8xf32>
    %73 = arith.addf %70, %72 : vector<4x8x8xf32>
    %cst_29 = arith.constant dense<0xFF800000> : vector<4x8xf32>
    %74 = vector.multi_reduction <maximumf>, %73, %cst_29 [2] : vector<4x8x8xf32> to vector<4x8xf32>
    %75 = vector.shape_cast %74 : vector<4x8xf32> to vector<4x8x1xf32>
    %76 = vector.broadcast %75 : vector<4x8x1xf32> to vector<4x8x8xf32>
    %77 = arith.subf %73, %76 : vector<4x8x8xf32>
    %78 = math.exp %77 : vector<4x8x8xf32>
    %cst_30 = arith.constant dense<0.000000e+00> : vector<4x8xf32>
    %79 = vector.multi_reduction <add>, %78, %cst_30 [2] : vector<4x8x8xf32> to vector<4x8xf32>
    %80 = vector.shape_cast %79 : vector<4x8xf32> to vector<4x8x1xf32>
    %81 = tpu.reciprocal %80 {approx = true} : vector<4x8x1xf32> -> vector<4x8x1xf32>
    %82 = vector.broadcast %81 : vector<4x8x1xf32> to vector<4x8x8xf32>
    %83 = arith.mulf %78, %82 : vector<4x8x8xf32>
    %84 = arith.truncf %83 : vector<4x8x8xf32> to vector<4x8x8xbf16>
    %cst_31 = arith.constant dense<0.000000e+00> : vector<4x8x8xf32>
    %85 = tpu.matmul %84, %69, %cst_31 {dimension_numbers = #tpu.dot_dimension_numbers<[2], [1], [1], [2], [0, 0, 0, 1, 1, 2], [0], [0]>} : vector<4x8x8xbf16>, vector<4x8x8xbf16>, vector<4x8x8xf32> -> vector<4x8x8xf32>
    %86 = vector.extract_strided_slice %85 {offsets = [0, 0, 0], sizes = [1, 8, 8], strides = [1, 1, 1]} : vector<4x8x8xf32> to vector<1x8x8xf32>
    %87 = vector.shape_cast %86 : vector<1x8x8xf32> to vector<8x8xf32>
    %88 = vector.extract_strided_slice %85 {offsets = [1, 0, 0], sizes = [1, 8, 8], strides = [1, 1, 1]} : vector<4x8x8xf32> to vector<1x8x8xf32>
    %89 = vector.shape_cast %88 : vector<1x8x8xf32> to vector<8x8xf32>
    %90 = vector.extract_strided_slice %85 {offsets = [2, 0, 0], sizes = [1, 8, 8], strides = [1, 1, 1]} : vector<4x8x8xf32> to vector<1x8x8xf32>
    %91 = vector.shape_cast %90 : vector<1x8x8xf32> to vector<8x8xf32>
    %92 = vector.extract_strided_slice %85 {offsets = [3, 0, 0], sizes = [1, 8, 8], strides = [1, 1, 1]} : vector<4x8x8xf32> to vector<1x8x8xf32>
    %93 = vector.shape_cast %92 : vector<1x8x8xf32> to vector<8x8xf32>
    %94 = tpu.concatenate %87, %89, %91, %93 in 1 : vector<8x8xf32>, vector<8x8xf32>, vector<8x8xf32>, vector<8x8xf32> -> vector<8x32xf32>
    %95 = arith.truncf %94 : vector<8x32xf32> to vector<8x32xbf16>
    %c0_32 = arith.constant 0 : index
    %c0_33 = arith.constant 0 : index
    %96 = vector.load %arg11[%c0_32, %c0_33] : memref<32x32xbf16, #tpu.memory_space<vmem>>, vector<32x32xbf16>
    %cst_34 = arith.constant dense<0.000000e+00> : vector<8x32xf32>
    %97 = tpu.matmul %95, %96, %cst_34 {dimension_numbers = #tpu.dot_dimension_numbers<[1], [0], [0], [1], [0, 0, 1, 1], [], []>} : vector<8x32xbf16>, vector<32x32xbf16>, vector<8x32xf32> -> vector<8x32xf32>
    %c0_35 = arith.constant 0 : index
    %c0_36 = arith.constant 0 : index
    %98 = vector.load %arg12[%c0_35, %c0_36] : memref<1x32xf32, #tpu.memory_space<vmem>>, vector<1x32xf32>
    %99 = vector.broadcast %98 : vector<1x32xf32> to vector<8x32xf32>
    %100 = arith.addf %97, %99 : vector<8x32xf32>
    %101 = arith.addf %21, %100 : vector<8x32xf32>
    %cst_37 = arith.constant dense<0.000000e+00> : vector<8xf32>
    %102 = vector.multi_reduction <add>, %101, %cst_37 [1] : vector<8x32xf32> to vector<8xf32>
    %103 = vector.shape_cast %102 : vector<8xf32> to vector<8x1xf32>
    %cst_38 = arith.constant 3.200000e+01 : f32
    %104 = vector.broadcast %cst_38 : f32 to vector<8x1xf32>
    %105 = arith.divf %103, %104 : vector<8x1xf32>
    %106 = vector.broadcast %105 : vector<8x1xf32> to vector<8x32xf32>
    %107 = arith.subf %101, %106 : vector<8x32xf32>
    %108 = arith.mulf %107, %107 : vector<8x32xf32>
    %cst_39 = arith.constant dense<0.000000e+00> : vector<8xf32>
    %109 = vector.multi_reduction <add>, %108, %cst_39 [1] : vector<8x32xf32> to vector<8xf32>
    %110 = vector.shape_cast %109 : vector<8xf32> to vector<8x1xf32>
    %cst_40 = arith.constant 3.200000e+01 : f32
    %111 = vector.broadcast %cst_40 : f32 to vector<8x1xf32>
    %112 = arith.divf %110, %111 : vector<8x1xf32>
    %cst_41 = arith.constant 9.99999997E-7 : f32
    %113 = vector.broadcast %cst_41 : f32 to vector<8x1xf32>
    %114 = arith.addf %112, %113 : vector<8x1xf32>
    %115 = math.rsqrt %114 : vector<8x1xf32>
    %116 = vector.broadcast %115 : vector<8x1xf32> to vector<8x32xf32>
    %117 = arith.mulf %107, %116 : vector<8x32xf32>
    %118 = arith.truncf %117 : vector<8x32xf32> to vector<8x32xbf16>
    %c0_42 = arith.constant 0 : index
    %c0_43 = arith.constant 0 : index
    %119 = vector.load %arg13[%c0_42, %c0_43] : memref<32x32xbf16, #tpu.memory_space<vmem>>, vector<32x32xbf16>
    %cst_44 = arith.constant dense<0.000000e+00> : vector<8x32xf32>
    %120 = tpu.matmul %118, %119, %cst_44 {dimension_numbers = #tpu.dot_dimension_numbers<[1], [0], [0], [1], [0, 0, 1, 1], [], []>} : vector<8x32xbf16>, vector<32x32xbf16>, vector<8x32xf32> -> vector<8x32xf32>
    %c0_45 = arith.constant 0 : index
    %c0_46 = arith.constant 0 : index
    %121 = vector.load %arg14[%c0_45, %c0_46] : memref<1x32xf32, #tpu.memory_space<vmem>>, vector<1x32xf32>
    %122 = vector.broadcast %121 : vector<1x32xf32> to vector<8x32xf32>
    %123 = arith.addf %120, %122 : vector<8x32xf32>
    %124 = arith.truncf %3 : vector<16x32xf32> to vector<16x32xbf16>
    %c0_47 = arith.constant 0 : index
    %c0_48 = arith.constant 0 : index
    %125 = vector.load %arg15[%c0_47, %c0_48] : memref<32x32xbf16, #tpu.memory_space<vmem>>, vector<32x32xbf16>
    %cst_49 = arith.constant dense<0.000000e+00> : vector<16x32xf32>
    %126 = tpu.matmul %124, %125, %cst_49 {dimension_numbers = #tpu.dot_dimension_numbers<[1], [0], [0], [1], [0, 0, 1, 1], [], []>} : vector<16x32xbf16>, vector<32x32xbf16>, vector<16x32xf32> -> vector<16x32xf32>
    %c0_50 = arith.constant 0 : index
    %c0_51 = arith.constant 0 : index
    %127 = vector.load %arg16[%c0_50, %c0_51] : memref<1x32xf32, #tpu.memory_space<vmem>>, vector<1x32xf32>
    %128 = vector.broadcast %127 : vector<1x32xf32> to vector<16x32xf32>
    %129 = arith.addf %126, %128 : vector<16x32xf32>
    %130 = arith.truncf %3 : vector<16x32xf32> to vector<16x32xbf16>
    %c0_52 = arith.constant 0 : index
    %c0_53 = arith.constant 0 : index
    %131 = vector.load %arg17[%c0_52, %c0_53] : memref<32x32xbf16, #tpu.memory_space<vmem>>, vector<32x32xbf16>
    %cst_54 = arith.constant dense<0.000000e+00> : vector<16x32xf32>
    %132 = tpu.matmul %130, %131, %cst_54 {dimension_numbers = #tpu.dot_dimension_numbers<[1], [0], [0], [1], [0, 0, 1, 1], [], []>} : vector<16x32xbf16>, vector<32x32xbf16>, vector<16x32xf32> -> vector<16x32xf32>
    %c0_55 = arith.constant 0 : index
    %c0_56 = arith.constant 0 : index
    %133 = vector.load %arg18[%c0_55, %c0_56] : memref<1x32xf32, #tpu.memory_space<vmem>>, vector<1x32xf32>
    %134 = vector.broadcast %133 : vector<1x32xf32> to vector<16x32xf32>
    %135 = arith.addf %132, %134 : vector<16x32xf32>
    %136 = vector.extract_strided_slice %123 {offsets = [0, 0], sizes = [8, 8], strides = [1, 1]} : vector<8x32xf32> to vector<8x8xf32>
    %137 = vector.extract_strided_slice %123 {offsets = [0, 8], sizes = [8, 8], strides = [1, 1]} : vector<8x32xf32> to vector<8x8xf32>
    %138 = vector.extract_strided_slice %123 {offsets = [0, 16], sizes = [8, 8], strides = [1, 1]} : vector<8x32xf32> to vector<8x8xf32>
    %139 = vector.extract_strided_slice %123 {offsets = [0, 24], sizes = [8, 8], strides = [1, 1]} : vector<8x32xf32> to vector<8x8xf32>
    %140 = vector.shape_cast %136 : vector<8x8xf32> to vector<1x8x8xf32>
    %141 = vector.shape_cast %137 : vector<8x8xf32> to vector<1x8x8xf32>
    %142 = vector.shape_cast %138 : vector<8x8xf32> to vector<1x8x8xf32>
    %143 = vector.shape_cast %139 : vector<8x8xf32> to vector<1x8x8xf32>
    %144 = tpu.concatenate %140, %141, %142, %143 in 0 : vector<1x8x8xf32>, vector<1x8x8xf32>, vector<1x8x8xf32>, vector<1x8x8xf32> -> vector<4x8x8xf32>
    %145 = arith.truncf %144 : vector<4x8x8xf32> to vector<4x8x8xbf16>
    %146 = vector.extract_strided_slice %129 {offsets = [0, 0], sizes = [16, 8], strides = [1, 1]} : vector<16x32xf32> to vector<16x8xf32>
    %147 = vector.extract_strided_slice %129 {offsets = [0, 8], sizes = [16, 8], strides = [1, 1]} : vector<16x32xf32> to vector<16x8xf32>
    %148 = vector.extract_strided_slice %129 {offsets = [0, 16], sizes = [16, 8], strides = [1, 1]} : vector<16x32xf32> to vector<16x8xf32>
    %149 = vector.extract_strided_slice %129 {offsets = [0, 24], sizes = [16, 8], strides = [1, 1]} : vector<16x32xf32> to vector<16x8xf32>
    %150 = vector.shape_cast %146 : vector<16x8xf32> to vector<1x16x8xf32>
    %151 = vector.shape_cast %147 : vector<16x8xf32> to vector<1x16x8xf32>
    %152 = vector.shape_cast %148 : vector<16x8xf32> to vector<1x16x8xf32>
    %153 = vector.shape_cast %149 : vector<16x8xf32> to vector<1x16x8xf32>
    %154 = tpu.concatenate %150, %151, %152, %153 in 0 : vector<1x16x8xf32>, vector<1x16x8xf32>, vector<1x16x8xf32>, vector<1x16x8xf32> -> vector<4x16x8xf32>
    %155 = arith.truncf %154 : vector<4x16x8xf32> to vector<4x16x8xbf16>
    %156 = vector.extract_strided_slice %135 {offsets = [0, 0], sizes = [16, 8], strides = [1, 1]} : vector<16x32xf32> to vector<16x8xf32>
    %157 = vector.extract_strided_slice %135 {offsets = [0, 8], sizes = [16, 8], strides = [1, 1]} : vector<16x32xf32> to vector<16x8xf32>
    %158 = vector.extract_strided_slice %135 {offsets = [0, 16], sizes = [16, 8], strides = [1, 1]} : vector<16x32xf32> to vector<16x8xf32>
    %159 = vector.extract_strided_slice %135 {offsets = [0, 24], sizes = [16, 8], strides = [1, 1]} : vector<16x32xf32> to vector<16x8xf32>
    %160 = vector.shape_cast %156 : vector<16x8xf32> to vector<1x16x8xf32>
    %161 = vector.shape_cast %157 : vector<16x8xf32> to vector<1x16x8xf32>
    %162 = vector.shape_cast %158 : vector<16x8xf32> to vector<1x16x8xf32>
    %163 = vector.shape_cast %159 : vector<16x8xf32> to vector<1x16x8xf32>
    %164 = tpu.concatenate %160, %161, %162, %163 in 0 : vector<1x16x8xf32>, vector<1x16x8xf32>, vector<1x16x8xf32>, vector<1x16x8xf32> -> vector<4x16x8xf32>
    %165 = arith.truncf %164 : vector<4x16x8xf32> to vector<4x16x8xbf16>
    %cst_57 = arith.constant dense<0.000000e+00> : vector<4x8x16xf32>
    %166 = tpu.matmul %145, %155, %cst_57 {dimension_numbers = #tpu.dot_dimension_numbers<[2], [2], [1], [1], [0, 0, 0, 1, 1, 1], [0], [0]>} : vector<4x8x8xbf16>, vector<4x16x8xbf16>, vector<4x8x16xf32> -> vector<4x8x16xf32>
    %167 = vector.shape_cast %5 : vector<8x16xf32> to vector<1x8x16xf32>
    %168 = vector.broadcast %167 : vector<1x8x16xf32> to vector<4x8x16xf32>
    %169 = arith.addf %166, %168 : vector<4x8x16xf32>
    %cst_58 = arith.constant dense<0xFF800000> : vector<4x8xf32>
    %170 = vector.multi_reduction <maximumf>, %169, %cst_58 [2] : vector<4x8x16xf32> to vector<4x8xf32>
    %171 = vector.shape_cast %170 : vector<4x8xf32> to vector<4x8x1xf32>
    %172 = vector.broadcast %171 : vector<4x8x1xf32> to vector<4x8x16xf32>
    %173 = arith.subf %169, %172 : vector<4x8x16xf32>
    %174 = math.exp %173 : vector<4x8x16xf32>
    %cst_59 = arith.constant dense<0.000000e+00> : vector<4x8xf32>
    %175 = vector.multi_reduction <add>, %174, %cst_59 [2] : vector<4x8x16xf32> to vector<4x8xf32>
    %176 = vector.shape_cast %175 : vector<4x8xf32> to vector<4x8x1xf32>
    %177 = tpu.reciprocal %176 {approx = true} : vector<4x8x1xf32> -> vector<4x8x1xf32>
    %178 = vector.broadcast %177 : vector<4x8x1xf32> to vector<4x8x16xf32>
    %179 = arith.mulf %174, %178 : vector<4x8x16xf32>
    %180 = arith.truncf %179 : vector<4x8x16xf32> to vector<4x8x16xbf16>
    %cst_60 = arith.constant dense<0.000000e+00> : vector<4x8x8xf32>
    %181 = tpu.matmul %180, %165, %cst_60 {dimension_numbers = #tpu.dot_dimension_numbers<[2], [1], [1], [2], [0, 0, 0, 1, 1, 2], [0], [0]>} : vector<4x8x16xbf16>, vector<4x16x8xbf16>, vector<4x8x8xf32> -> vector<4x8x8xf32>
    %182 = vector.extract_strided_slice %181 {offsets = [0, 0, 0], sizes = [1, 8, 8], strides = [1, 1, 1]} : vector<4x8x8xf32> to vector<1x8x8xf32>
    %183 = vector.shape_cast %182 : vector<1x8x8xf32> to vector<8x8xf32>
    %184 = vector.extract_strided_slice %181 {offsets = [1, 0, 0], sizes = [1, 8, 8], strides = [1, 1, 1]} : vector<4x8x8xf32> to vector<1x8x8xf32>
    %185 = vector.shape_cast %184 : vector<1x8x8xf32> to vector<8x8xf32>
    %186 = vector.extract_strided_slice %181 {offsets = [2, 0, 0], sizes = [1, 8, 8], strides = [1, 1, 1]} : vector<4x8x8xf32> to vector<1x8x8xf32>
    %187 = vector.shape_cast %186 : vector<1x8x8xf32> to vector<8x8xf32>
    %188 = vector.extract_strided_slice %181 {offsets = [3, 0, 0], sizes = [1, 8, 8], strides = [1, 1, 1]} : vector<4x8x8xf32> to vector<1x8x8xf32>
    %189 = vector.shape_cast %188 : vector<1x8x8xf32> to vector<8x8xf32>
    %190 = tpu.concatenate %183, %185, %187, %189 in 1 : vector<8x8xf32>, vector<8x8xf32>, vector<8x8xf32>, vector<8x8xf32> -> vector<8x32xf32>
    %191 = arith.truncf %190 : vector<8x32xf32> to vector<8x32xbf16>
    %c0_61 = arith.constant 0 : index
    %c0_62 = arith.constant 0 : index
    %192 = vector.load %arg19[%c0_61, %c0_62] : memref<32x32xbf16, #tpu.memory_space<vmem>>, vector<32x32xbf16>
    %cst_63 = arith.constant dense<0.000000e+00> : vector<8x32xf32>
    %193 = tpu.matmul %191, %192, %cst_63 {dimension_numbers = #tpu.dot_dimension_numbers<[1], [0], [0], [1], [0, 0, 1, 1], [], []>} : vector<8x32xbf16>, vector<32x32xbf16>, vector<8x32xf32> -> vector<8x32xf32>
    %c0_64 = arith.constant 0 : index
    %c0_65 = arith.constant 0 : index
    %194 = vector.load %arg20[%c0_64, %c0_65] : memref<1x32xf32, #tpu.memory_space<vmem>>, vector<1x32xf32>
    %195 = vector.broadcast %194 : vector<1x32xf32> to vector<8x32xf32>
    %196 = arith.addf %193, %195 : vector<8x32xf32>
    %197 = arith.addf %117, %196 : vector<8x32xf32>
    %cst_66 = arith.constant dense<0.000000e+00> : vector<8xf32>
    %198 = vector.multi_reduction <add>, %197, %cst_66 [1] : vector<8x32xf32> to vector<8xf32>
    %199 = vector.shape_cast %198 : vector<8xf32> to vector<8x1xf32>
    %cst_67 = arith.constant 3.200000e+01 : f32
    %200 = vector.broadcast %cst_67 : f32 to vector<8x1xf32>
    %201 = arith.divf %199, %200 : vector<8x1xf32>
    %202 = vector.broadcast %201 : vector<8x1xf32> to vector<8x32xf32>
    %203 = arith.subf %197, %202 : vector<8x32xf32>
    %204 = arith.mulf %203, %203 : vector<8x32xf32>
    %cst_68 = arith.constant dense<0.000000e+00> : vector<8xf32>
    %205 = vector.multi_reduction <add>, %204, %cst_68 [1] : vector<8x32xf32> to vector<8xf32>
    %206 = vector.shape_cast %205 : vector<8xf32> to vector<8x1xf32>
    %cst_69 = arith.constant 3.200000e+01 : f32
    %207 = vector.broadcast %cst_69 : f32 to vector<8x1xf32>
    %208 = arith.divf %206, %207 : vector<8x1xf32>
    %cst_70 = arith.constant 9.99999997E-7 : f32
    %209 = vector.broadcast %cst_70 : f32 to vector<8x1xf32>
    %210 = arith.addf %208, %209 : vector<8x1xf32>
    %211 = math.rsqrt %210 : vector<8x1xf32>
    %212 = vector.broadcast %211 : vector<8x1xf32> to vector<8x32xf32>
    %213 = arith.mulf %203, %212 : vector<8x32xf32>
    %214 = arith.truncf %213 : vector<8x32xf32> to vector<8x32xbf16>
    %c0_71 = arith.constant 0 : index
    %c0_72 = arith.constant 0 : index
    %215 = vector.load %arg21[%c0_71, %c0_72] : memref<32x128xbf16, #tpu.memory_space<vmem>>, vector<32x128xbf16>
    %cst_73 = arith.constant dense<0.000000e+00> : vector<8x128xf32>
    %216 = tpu.matmul %214, %215, %cst_73 {dimension_numbers = #tpu.dot_dimension_numbers<[1], [0], [0], [1], [0, 0, 1, 1], [], []>} : vector<8x32xbf16>, vector<32x128xbf16>, vector<8x128xf32> -> vector<8x128xf32>
    %c0_74 = arith.constant 0 : index
    %c0_75 = arith.constant 0 : index
    %217 = vector.load %arg22[%c0_74, %c0_75] : memref<1x128xf32, #tpu.memory_space<vmem>>, vector<1x128xf32>
    %218 = vector.broadcast %217 : vector<1x128xf32> to vector<8x128xf32>
    %219 = arith.addf %216, %218 : vector<8x128xf32>
    %cst_76 = arith.constant 0.707106769 : f32
    %220 = vector.broadcast %cst_76 : f32 to vector<8x128xf32>
    %221 = arith.mulf %219, %220 : vector<8x128xf32>
    %222 = math.absf %221 : vector<8x128xf32>
    %cst_77 = arith.constant 0.327591091 : f32
    %223 = vector.broadcast %cst_77 : f32 to vector<8x128xf32>
    %224 = arith.mulf %223, %222 : vector<8x128xf32>
    %cst_78 = arith.constant 1.000000e+00 : f32
    %225 = vector.broadcast %cst_78 : f32 to vector<8x128xf32>
    %226 = arith.addf %225, %224 : vector<8x128xf32>
    %cst_79 = arith.constant 1.000000e+00 : f32
    %227 = vector.broadcast %cst_79 : f32 to vector<8x128xf32>
    %228 = arith.divf %227, %226 : vector<8x128xf32>
    %cst_80 = arith.constant 1.06140542 : f32
    %229 = vector.broadcast %cst_80 : f32 to vector<8x128xf32>
    %230 = arith.mulf %228, %229 : vector<8x128xf32>
    %cst_81 = arith.constant -1.45315206 : f32
    %231 = vector.broadcast %cst_81 : f32 to vector<8x128xf32>
    %232 = arith.addf %231, %230 : vector<8x128xf32>
    %233 = arith.mulf %228, %232 : vector<8x128xf32>
    %cst_82 = arith.constant 1.42141378 : f32
    %234 = vector.broadcast %cst_82 : f32 to vector<8x128xf32>
    %235 = arith.addf %234, %233 : vector<8x128xf32>
    %236 = arith.mulf %228, %235 : vector<8x128xf32>
    %cst_83 = arith.constant -0.284496725 : f32
    %237 = vector.broadcast %cst_83 : f32 to vector<8x128xf32>
    %238 = arith.addf %237, %236 : vector<8x128xf32>
    %239 = arith.mulf %228, %238 : vector<8x128xf32>
    %cst_84 = arith.constant 0.254829586 : f32
    %240 = vector.broadcast %cst_84 : f32 to vector<8x128xf32>
    %241 = arith.addf %240, %239 : vector<8x128xf32>
    %242 = arith.mulf %228, %241 : vector<8x128xf32>
    %243 = arith.mulf %222, %222 : vector<8x128xf32>
    %cst_85 = arith.constant 0.000000e+00 : f32
    %244 = vector.broadcast %cst_85 : f32 to vector<8x128xf32>
    %245 = arith.subf %244, %243 : vector<8x128xf32>
    %246 = math.exp %245 : vector<8x128xf32>
    %247 = arith.mulf %242, %246 : vector<8x128xf32>
    %cst_86 = arith.constant 1.000000e+00 : f32
    %248 = vector.broadcast %cst_86 : f32 to vector<8x128xf32>
    %249 = arith.subf %248, %247 : vector<8x128xf32>
    %cst_87 = arith.constant 0.000000e+00 : f32
    %250 = vector.broadcast %cst_87 : f32 to vector<8x128xf32>
    %251 = arith.cmpf oge, %221, %250 : vector<8x128xf32>
    %cst_88 = arith.constant 0.000000e+00 : f32
    %252 = vector.broadcast %cst_88 : f32 to vector<8x128xf32>
    %253 = arith.subf %252, %249 : vector<8x128xf32>
    %254 = arith.select %251, %249, %253 : vector<8x128xi1>, vector<8x128xf32>
    %cst_89 = arith.constant 5.000000e-01 : f32
    %255 = vector.broadcast %cst_89 : f32 to vector<8x128xf32>
    %256 = arith.mulf %255, %219 : vector<8x128xf32>
    %cst_90 = arith.constant 1.000000e+00 : f32
    %257 = vector.broadcast %cst_90 : f32 to vector<8x128xf32>
    %258 = arith.addf %257, %254 : vector<8x128xf32>
    %259 = arith.mulf %256, %258 : vector<8x128xf32>
    %260 = arith.truncf %259 : vector<8x128xf32> to vector<8x128xbf16>
    %c0_91 = arith.constant 0 : index
    %c0_92 = arith.constant 0 : index
    %261 = vector.load %arg23[%c0_91, %c0_92] : memref<128x32xbf16, #tpu.memory_space<vmem>>, vector<128x32xbf16>
    %cst_93 = arith.constant dense<0.000000e+00> : vector<8x32xf32>
    %262 = tpu.matmul %260, %261, %cst_93 {dimension_numbers = #tpu.dot_dimension_numbers<[1], [0], [0], [1], [0, 0, 1, 1], [], []>} : vector<8x128xbf16>, vector<128x32xbf16>, vector<8x32xf32> -> vector<8x32xf32>
    %c0_94 = arith.constant 0 : index
    %c0_95 = arith.constant 0 : index
    %263 = vector.load %arg24[%c0_94, %c0_95] : memref<1x32xf32, #tpu.memory_space<vmem>>, vector<1x32xf32>
    %264 = vector.broadcast %263 : vector<1x32xf32> to vector<8x32xf32>
    %265 = arith.addf %262, %264 : vector<8x32xf32>
    %266 = arith.addf %197, %265 : vector<8x32xf32>
    %c0_96 = arith.constant 0 : index
    %c0_97 = arith.constant 0 : index
    %c0_98 = arith.constant 0 : index
    %267 = vector.load %arg25[%c0_96, %c0_97, %c0_98] : memref<1x8x32xf32, #tpu.memory_space<vmem>>, vector<1x8x32xf32>
    %268 = vector.shape_cast %267 : vector<1x8x32xf32> to vector<8x32xf32>
    %269 = vector.shape_cast %266 : vector<8x32xf32> to vector<1x8x32xf32>
    tpu.vector_store %arg25[%c0_96, %c0_97, %c0_98], %269 {strides = array<i32>} : memref<1x8x32xf32, #tpu.memory_space<vmem>>, vector<1x8x32xf32>,
    return
  }
  func.func @transform_0(%arg0: i32) -> (i32, i32, i32) {
    %c0_i32 = arith.constant 0 : i32
    %c0_i32_0 = arith.constant 0 : i32
    %c0_i32_1 = arith.constant 0 : i32
    return %arg0, %c0_i32, %c0_i32_0 : i32, i32, i32
  }
  func.func @transform_1(%arg0: i32) -> (i32, i32, i32) {
    %c0_i32 = arith.constant 0 : i32
    %c0_i32_0 = arith.constant 0 : i32
    %c0_i32_1 = arith.constant 0 : i32
    return %arg0, %c0_i32, %c0_i32_0 : i32, i32, i32
  }
  func.func @transform_2(%arg0: i32) -> (i32, i32) {
    %c0_i32 = arith.constant 0 : i32
    %c0_i32_0 = arith.constant 0 : i32
    %c0_i32_1 = arith.constant 0 : i32
    return %c0_i32, %c0_i32_0 : i32, i32
  }
  func.func @transform_3(%arg0: i32) -> (i32, i32) {
    %c0_i32 = arith.constant 0 : i32
    %c0_i32_0 = arith.constant 0 : i32
    %c0_i32_1 = arith.constant 0 : i32
    return %c0_i32, %c0_i32_0 : i32, i32
  }
  func.func @transform_4(%arg0: i32) -> (i32, i32) {
    %c0_i32 = arith.constant 0 : i32
    %c0_i32_0 = arith.constant 0 : i32
    %c0_i32_1 = arith.constant 0 : i32
    return %c0_i32, %c0_i32_0 : i32, i32
  }
  func.func @transform_5(%arg0: i32) -> (i32, i32) {
    %c0_i32 = arith.constant 0 : i32
    %c0_i32_0 = arith.constant 0 : i32
    %c0_i32_1 = arith.constant 0 : i32
    return %c0_i32, %c0_i32_0 : i32, i32
  }
  func.func @transform_6(%arg0: i32) -> (i32, i32) {
    %c0_i32 = arith.constant 0 : i32
    %c0_i32_0 = arith.constant 0 : i32
    %c0_i32_1 = arith.constant 0 : i32
    return %c0_i32, %c0_i32_0 : i32, i32
  }
  func.func @transform_7(%arg0: i32) -> (i32, i32) {
    %c0_i32 = arith.constant 0 : i32
    %c0_i32_0 = arith.constant 0 : i32
    %c0_i32_1 = arith.constant 0 : i32
    return %c0_i32, %c0_i32_0 : i32, i32
  }
  func.func @transform_8(%arg0: i32) -> (i32, i32) {
    %c0_i32 = arith.constant 0 : i32
    %c0_i32_0 = arith.constant 0 : i32
    %c0_i32_1 = arith.constant 0 : i32
    return %c0_i32, %c0_i32_0 : i32, i32
  }
  func.func @transform_9(%arg0: i32) -> (i32, i32) {
    %c0_i32 = arith.constant 0 : i32
    %c0_i32_0 = arith.constant 0 : i32
    %c0_i32_1 = arith.constant 0 : i32
    return %c0_i32, %c0_i32_0 : i32, i32
  }
  func.func @transform_10(%arg0: i32) -> (i32, i32) {
    %c0_i32 = arith.constant 0 : i32
    %c0_i32_0 = arith.constant 0 : i32
    %c0_i32_1 = arith.constant 0 : i32
    return %c0_i32, %c0_i32_0 : i32, i32
  }
  func.func @transform_11(%arg0: i32) -> (i32, i32) {
    %c0_i32 = arith.constant 0 : i32
    %c0_i32_0 = arith.constant 0 : i32
    %c0_i32_1 = arith.constant 0 : i32
    return %c0_i32, %c0_i32_0 : i32, i32
  }
  func.func @transform_12(%arg0: i32) -> (i32, i32) {
    %c0_i32 = arith.constant 0 : i32
    %c0_i32_0 = arith.constant 0 : i32
    %c0_i32_1 = arith.constant 0 : i32
    return %c0_i32, %c0_i32_0 : i32, i32
  }
  func.func @transform_13(%arg0: i32) -> (i32, i32) {
    %c0_i32 = arith.constant 0 : i32
    %c0_i32_0 = arith.constant 0 : i32
    %c0_i32_1 = arith.constant 0 : i32
    return %c0_i32, %c0_i32_0 : i32, i32
  }
  func.func @transform_14(%arg0: i32) -> (i32, i32) {
    %c0_i32 = arith.constant 0 : i32
    %c0_i32_0 = arith.constant 0 : i32
    %c0_i32_1 = arith.constant 0 : i32
    return %c0_i32, %c0_i32_0 : i32, i32
  }
  func.func @transform_15(%arg0: i32) -> (i32, i32) {
    %c0_i32 = arith.constant 0 : i32
    %c0_i32_0 = arith.constant 0 : i32
    %c0_i32_1 = arith.constant 0 : i32
    return %c0_i32, %c0_i32_0 : i32, i32
  }
  func.func @transform_16(%arg0: i32) -> (i32, i32) {
    %c0_i32 = arith.constant 0 : i32
    %c0_i32_0 = arith.constant 0 : i32
    %c0_i32_1 = arith.constant 0 : i32
    return %c0_i32, %c0_i32_0 : i32, i32
  }
  func.func @transform_17(%arg0: i32) -> (i32, i32) {
    %c0_i32 = arith.constant 0 : i32
    %c0_i32_0 = arith.constant 0 : i32
    %c0_i32_1 = arith.constant 0 : i32
    return %c0_i32, %c0_i32_0 : i32, i32
  }
  func.func @transform_18(%arg0: i32) -> (i32, i32) {
    %c0_i32 = arith.constant 0 : i32
    %c0_i32_0 = arith.constant 0 : i32
    %c0_i32_1 = arith.constant 0 : i32
    return %c0_i32, %c0_i32_0 : i32, i32
  }
  func.func @transform_19(%arg0: i32) -> (i32, i32) {
    %c0_i32 = arith.constant 0 : i32
    %c0_i32_0 = arith.constant 0 : i32
    %c0_i32_1 = arith.constant 0 : i32
    return %c0_i32, %c0_i32_0 : i32, i32
  }
  func.func @transform_20(%arg0: i32) -> (i32, i32) {
    %c0_i32 = arith.constant 0 : i32
    %c0_i32_0 = arith.constant 0 : i32
    %c0_i32_1 = arith.constant 0 : i32
    return %c0_i32, %c0_i32_0 : i32, i32
  }
  func.func @transform_21(%arg0: i32) -> (i32, i32) {
    %c0_i32 = arith.constant 0 : i32
    %c0_i32_0 = arith.constant 0 : i32
    %c0_i32_1 = arith.constant 0 : i32
    return %c0_i32, %c0_i32_0 : i32, i32
  }
  func.func @transform_22(%arg0: i32) -> (i32, i32) {
    %c0_i32 = arith.constant 0 : i32
    %c0_i32_0 = arith.constant 0 : i32
    %c0_i32_1 = arith.constant 0 : i32
    return %c0_i32, %c0_i32_0 : i32, i32
  }
  func.func @transform_23(%arg0: i32) -> (i32, i32) {
    %c0_i32 = arith.constant 0 : i32
    %c0_i32_0 = arith.constant 0 : i32
    %c0_i32_1 = arith.constant 0 : i32
    return %c0_i32, %c0_i32_0 : i32, i32
  }
  func.func @transform_24(%arg0: i32) -> (i32, i32, i32) {
    %c0_i32 = arith.constant 0 : i32
    %c0_i32_0 = arith.constant 0 : i32
    %c0_i32_1 = arith.constant 0 : i32
    return %arg0, %c0_i32, %c0_i32_0 : i32, i32, i32
  }
}

</mosaic_0001>

<bundles_post_ra>
// kernel: tpu_custom_call.1
= control target key start
LH: loop header
LB: loop body
LE: loop exit
PB: predicated region body
PF: predicated region fallthrough
CT: control target
= control target key end

     0   :  { %s3839_s0 = inlined_call_operand.vmem [shape: f32[2,8,32], index: 0, kind: input, shape index: {}]   ;;  %s3840_s1 = inlined_call_operand.vmem [shape: f32[2,16,32], index: 1, kind: input, shape index: {}]   ;;  %s3841_s2 = inlined_call_operand.hbm [shape: f32[8,8], index: 2, kind: input, shape index: {}]   ;;  %s3842_s3 = inlined_call_operand.hbm [shape: f32[8,16], index: 3, kind: input, shape index: {}]   ;;  %s3843_s4 = inlined_call_operand.vmem [shape: bf16[32,32], index: 4, kind: input, shape index: {}]   ;;  %s3844_s5 = inlined_call_operand.vmem [shape: f32[1,32], index: 5, kind: input, shape index: {}]   ;;  %s3845_s6 = inlined_call_operand.vmem [shape: bf16[32,32], index: 6, kind: input, shape index: {}]   ;;  %s3846_s7 = inlined_call_operand.vmem [shape: f32[1,32], index: 7, kind: input, shape index: {}]   ;;  %s3847_s8 = inlined_call_operand.hbm [shape: bf16[32,32], index: 8, kind: input, shape index: {}]   ;;  %s3848_s9 = inlined_call_operand.vmem [shape: f32[1,32], index: 9, kind: input, shape index: {}]   ;;  %s3849_s10 = inlined_call_operand.hbm [shape: bf16[32,32], index: 10, kind: input, shape index: {}]   ;;  %s3850_s11 = inlined_call_operand.vmem [shape: f32[1,32], index: 11, kind: input, shape index: {}]   ;;  %s3851_s12 = inlined_call_operand.hbm [shape: bf16[32,32], index: 12, kind: input, shape index: {}]   ;;  %s3852_s13 = inlined_call_operand.vmem [shape: f32[1,32], index: 13, kind: input, shape index: {}]   ;;  %s3853_s14 = inlined_call_operand.hbm [shape: bf16[32,32], index: 14, kind: input, shape index: {}]   ;;  %s3854_s15 = inlined_call_operand.hbm [shape: f32[1,32], index: 15, kind: input, shape index: {}]   ;;  %s3855_s16 = inlined_call_operand.hbm [shape: bf16[32,32], index: 16, kind: input, shape index: {}]   ;;  %s3856_s17 = inlined_call_operand.hbm [shape: f32[1,32], index: 17, kind: input, shape index: {}]   ;;  %s3857_s18 = inlined_call_operand.hbm [shape: bf16[32,32], index: 18, kind: input, shape index: {}]   ;;  %s3858_s19 = inlined_call_operand.hbm [shape: f32[1,32], index: 19, kind: input, shape index: {}]   ;;  %s3859_s20 = inlined_call_operand.hbm [shape: bf16[32,128], index: 20, kind: input, shape index: {}]   ;;  %s3860_s21 = inlined_call_operand.hbm [shape: f32[1,128], index: 21, kind: input, shape index: {}]   ;;  %s3861_s22 = inlined_call_operand.vmem [shape: bf16[128,32], index: 22, kind: input, shape index: {}]   ;;  %s3862_s23 = inlined_call_operand.hbm [shape: f32[1,32], index: 23, kind: input, shape index: {}]   ;;  %s3863_s24 = inlined_call_operand.hbm [shape: f32[2,8,32], index: 24, kind: output, shape index: {}]  }
   0x1   :  { %3875 = sst [smem:[#allocation42_spill]] %s3839_s0 }
   0x2   :  { %3876 = sst [smem:[#allocation43_spill]] %s3840_s1 }
   0x3   :  { %3877 = sst [smem:[#allocation44_spill]] %s3841_s2 }
   0x4   :  { %3878 = sst [smem:[#allocation45_spill]] %s3842_s3 }
   0x5   :  { %3879 = sst [smem:[#allocation46_spill]] %s3843_s4 }
   0x6   :  { %3880 = sst [smem:[#allocation47_spill]] %s3844_s5 }
   0x7   :  { %3881 = sst [smem:[#allocation48_spill]] %s3845_s6 }
   0x8   :  { %3882 = sst [smem:[#allocation49_spill]] %s3846_s7 }
   0x9   :  { %3883 = sst [smem:[#allocation50_spill]] %s3847_s8 }
   0xa   :  { %3884 = sst [smem:[#allocation51_spill]] %s3849_s10 }
   0xb   :  { %3885 = sst [smem:[#allocation52_spill]] %s3853_s14 }
   0xc   :  { %3886 = sst [smem:[#allocation53_spill]] %s3855_s16 }
   0xd   :  { %3887 = sst [smem:[#allocation54_spill]] %s3857_s18 }
   0xe   :  { %3888 = sst [smem:[#allocation55_spill]] %s3863_s24 }
   0xf   :  { %29 = vsyncpa [#allocation3], 0 }
  0x10   :  { %30 = vsyncpa [#allocation6], 0 }
  0x11   :  { %31 = vsyncpa [#allocation9], 0 }
  0x12   :  { %32 = vsyncpa [#allocation12], 0 }
  0x13   :  { %33 = vsyncpa [#allocation15], 0 }
  0x14   :  { %34 = vsyncpa [#allocation18], 0 }
  0x15   :  { %35 = vsyncpa [#allocation21], 0 }
  0x16   :  { %36 = vsyncpa [#allocation24], 0 }
  0x17   :  { %37 = vsyncpa [#allocation4], 0 }
  0x18   :  { %39 = vsyncpa [#allocation4 + $0x1], 0  ;;  %s3434_s5 = smov 0   ;;  %s3436_s26 = smov 0  }
  0x19   :  { %s3438_s27 = smov 0   ;;  %s3440_s28 = smov 0  }
  0x1a LB: > { %3889 = sst [smem:[#allocation35_spill]] %s3272_s5  ;;  %s3455_s6 = sadd.s32 4294967295, %s3284_s28   ;;  %s3284_s28 = sphi %s3440_s28, %s3918_s28   ;;  %s3280_s27 = sphi %s3438_s27, %s3920_s27   ;;  %s3276_s26 = sphi %s3436_s26, %s3922_s26   ;;  %s3272_s5 = sphi %s3434_s5, %s3921_s5  }
  0x1b   : > { %3890 = sst [smem:[#allocation36_spill]] %s3280_s27  ;;  %s2301_s2 = sadd.s32 4294967294, %s3284_s28  }
  0x1c   : > { %3891 = sst [smem:[#allocation37_spill]] %s3284_s28  ;;  %s3459_s29 = sadd.s32 1, %s3284_s28  }
  0x1d   : > { %3892 = sst [smem:[#allocation38_spill]] %s3459_s29  ;;  %s566_s0 = sadd.s32 1, %s3280_s27 }
  0x1e   : > { %s563_s7 = ssub.s32 %s3284_s28, %s3459_s29  ;;  %p576_p0 = scmp.ne.s32.totalorder %s3280_s27, %s3276_s26 }
  0x1f   : > { %p564_p1 = scmp.eq.s32.totalorder %s563_s7, 0  ;;  %p577_p2 = scmp.eq.s32.totalorder %s3455_s6, 1 }
  0x20   : > { %p582_p3 = scmp.ne.s32.totalorder %s3276_s26, %s3272_s5  ;;  %p583_p4 = scmp.eq.s32.totalorder %s2301_s2, 1 }
  0x21   : > { %s3470_s30 = scalar_select %p564_p1, %s3280_s27, %s566_s0  }
  0x22   : > { %p3472_p5 = por %p577_p2, %p576_p0  ;;  %p3476_p6 = por %p583_p4, %p582_p3 }
  0x23   : > { %3893 = sst [smem:[#allocation39_spill]] %s3470_s30  ;;  %p2302_p7 = scmp.ge.s32.totalorder %s3284_s28, 1 }
  0x24   : > { %s3894_s3 = scalar_select %p3472_p5, 1, 0 }
  0x25   : > { %s3896_s25 = scalar_select %p3476_p6, 1, 0 }
  0x26   : > { %3895 = sst [smem:[#allocation40_spill]] %s3894_s3  ;;  %p590_p8 = scmp.lt.s32.totalorder %s3284_s28, 3 }
  0x27   : > { %3897 = sst [smem:[#allocation41_spill]] %s3896_s25  ;;  %p2602_p9 = scmp.eq.s32.totalorder %s3455_s6, 0 }
  0x28   : > { %p3483_p10 = pnand %p2302_p7, %p590_p8  ;;  %s3899_s2 = sld [smem:[#allocation45_spill]] }
  0x29   : > { %s3286_s7 = smov [#allocation5]   ;;  %s3901_s10 = sld [smem:[#allocation51_spill]] }
  0x2a   : > { %p2555_p11 = pneg %p3483_p10  ;;  %s616_s30 = sshll.u32 %s3286_s7, 4  ;;  %s617_s30 = int_to_ptr.vmem [resolvable:$true] %s616_s30 }
  0x2b   : > { %s3287_s4 = smov [#allocation8]   ;;  %s3902_s14 = sld [smem:[#allocation52_spill]] }
  0x2c   : > { %p3494_p12 = pnand %p2602_p9, %p2555_p11  ;;  %s656_s1 = sshll.u32 %s3287_s4, 4  ;;  %s657_s1 = int_to_ptr.vmem [resolvable:$true] %s656_s1 }
  0x2d   : > { %s3288_s3 = smov 64   ;;  %s3289_s24 = smov 4  }
  0x2e   : > { %s614_s0 = sshll.u32 %s3899_s2, 4  ;;  %s3903_s16 = sld [smem:[#allocation53_spill]]  ;;  %s615_s0 = int_to_ptr.hbm [resolvable:$true] %s614_s0 }
  0x2f   : > { %s654_s5 = sshll.u32 %s3901_s10, 4  ;;  %s3291_s2 = smov [#allocation14]   ;;  %s655_s5 = int_to_ptr.hbm [resolvable:$true] %s654_s5 }
  0x30   : > { %2561 = dma.hbm_to_vmem [thread:$0]  (!%p3494_p12), %s615_s0, 128, %s617_s30, [#allocation6]  }
  0x31   : > { %s688_s28 = sshll.u32 %s3902_s14, 4  ;;  %s3290_s0 = smov [#allocation11]   ;;  %s689_s28 = int_to_ptr.hbm [resolvable:$true] %s688_s28 }
  0x32   : > { %2567 = dma.hbm_to_vmem [thread:$0]  (!%p3494_p12), %s655_s5, 256, %s657_s1, [#allocation9], %s3288_s3, %s3288_s3, %s3289_s24  }
  0x33   : > { %s690_s4 = sshll.u32 %s3290_s0, 4  ;;  %s716_s7 = sshll.u32 %s3291_s2, 4  ;;  %s691_s4 = int_to_ptr.vmem [resolvable:$true] %s690_s4  ;;  %s717_s7 = int_to_ptr.vmem [resolvable:$true] %s716_s7 }
  0x34   : > { %s714_s30 = sshll.u32 %s3903_s16, 4  ;;  %s3904_s18 = sld [smem:[#allocation54_spill]]  ;;  %s715_s30 = int_to_ptr.hbm [resolvable:$true] %s714_s30 }
  0x35   : > { %2573 = dma.hbm_to_vmem [thread:$0]  (!%p3494_p12), %s689_s28, 256, %s691_s4, [#allocation12], %s3288_s3, %s3288_s3, %s3289_s24  }
  0x36   : > { %2579 = dma.hbm_to_vmem [thread:$0]  (!%p3494_p12), %s715_s30, 256, %s717_s7, [#allocation15], %s3288_s3, %s3288_s3, %s3289_s24  }
  0x37   : > { %s766_s25 = sshll.u32 %s3859_s20, 4  ;;  %s3292_s0 = smov [#allocation17]   ;;  %s767_s25 = int_to_ptr.hbm [resolvable:$true] %s766_s25 }
  0x38   : > { %s742_s28 = sshll.u32 %s3292_s0, 4  ;;  %s3293_s10 = smov [#allocation20]   ;;  %s743_s28 = int_to_ptr.vmem [resolvable:$true] %s742_s28 }
  0x39   : > { %s768_s14 = sshll.u32 %s3293_s10, 4  ;;  %s3905_s16 = sld [smem:[#allocation44_spill]]  ;;  %s769_s14 = int_to_ptr.vmem [resolvable:$true] %s768_s14 }
  0x3a   : > { %s740_s5 = sshll.u32 %s3904_s18, 4  ;;  %s3906_s29 = sld [smem:[#allocation50_spill]]  ;;  %s741_s5 = int_to_ptr.hbm [resolvable:$true] %s740_s5 }
  0x3b   : > { %2585 = dma.hbm_to_vmem [thread:$0]  (!%p3494_p12), %s741_s5, 256, %s743_s28, [#allocation18], %s3288_s3, %s3288_s3, %s3289_s24  }
  0x3c   : > { %2591 = dma.hbm_to_vmem [thread:$0]  (!%p3494_p12), %s767_s25, 256, %s769_s14, [#allocation21], %s3288_s3, %s3288_s3, %s3289_s24  }
  0x3d   : > { %s3294_s18 = smov [#allocation2]   ;;  %s3295_s28 = smov [#allocation7]  }
  0x3e   : > { %s604_s5 = sshll.u32 %s3294_s18, 4  ;;  %s671_s2 = sshll.u32 %s3851_s12, 4  ;;  %s605_s5 = int_to_ptr.vmem [resolvable:$true] %s604_s5  ;;  %s672_s2 = int_to_ptr.hbm [resolvable:$true] %s671_s2 }
  0x3f   : > { %s602_s30 = sshll.u32 %s3905_s16, 4  ;;  %s639_s16 = sshll.u32 %s3295_s28, 4  ;;  %s603_s30 = int_to_ptr.hbm [resolvable:$true] %s602_s30  ;;  %s640_s16 = int_to_ptr.vmem [resolvable:$true] %s639_s16 }
  0x40   : > { %s637_s0 = sshll.u32 %s3906_s29, 4  ;;  %s703_s14 = sshll.u32 %s3854_s15, 4  ;;  %s638_s0 = int_to_ptr.hbm [resolvable:$true] %s637_s0  ;;  %s704_s14 = int_to_ptr.hbm [resolvable:$true] %s703_s14 }
  0x41   : > { %2558 = dma.hbm_to_vmem [thread:$0]  (!%p3494_p12), %s603_s30, 128, %s605_s5, [#allocation3]  }
  0x42   : > { %2564 = dma.hbm_to_vmem [thread:$0]  (!%p3494_p12), %s638_s0, 256, %s640_s16, [#allocation6], %s3288_s3, %s3288_s3, %s3289_s24  }
  0x43   : > { %s3296_s7 = smov [#allocation10]   ;;  %s3297_s1 = smov [#allocation13]  }
  0x44   : > { %s673_s30 = sshll.u32 %s3296_s7, 4  ;;  %s705_s29 = sshll.u32 %s3297_s1, 4  ;;  %s674_s30 = int_to_ptr.vmem [resolvable:$true] %s673_s30  ;;  %s706_s29 = int_to_ptr.vmem [resolvable:$true] %s705_s29 }
  0x45   : > { %2570 = dma.hbm_to_vmem [thread:$0]  (!%p3494_p12), %s672_s2, 256, %s674_s30, [#allocation9], %s3288_s3, %s3288_s3, %s3289_s24  }
  0x46   : > { %s729_s0 = sshll.u32 %s3856_s17, 4  ;;  %s755_s4 = sshll.u32 %s3858_s19, 4  ;;  %s730_s0 = int_to_ptr.hbm [resolvable:$true] %s729_s0  ;;  %s756_s4 = int_to_ptr.hbm [resolvable:$true] %s755_s4 }
  0x47   : > { %2576 = dma.hbm_to_vmem [thread:$0]  (!%p3494_p12), %s704_s14, 16, %s706_s29, [#allocation12]  }
  0x48   : > { %s3298_s25 = smov [#allocation16]   ;;  %s3299_s24 = smov [#allocation19]  }
  0x49   : > { %s731_s18 = sshll.u32 %s3298_s25, 4  ;;  %s757_s3 = sshll.u32 %s3299_s24, 4  ;;  %s732_s18 = int_to_ptr.vmem [resolvable:$true] %s731_s18  ;;  %s758_s3 = int_to_ptr.vmem [resolvable:$true] %s757_s3 }
  0x4a   : > { %2582 = dma.hbm_to_vmem [thread:$0]  (!%p3494_p12), %s730_s0, 16, %s732_s18, [#allocation15]  }
  0x4b   : > { %s781_s30 = sshll.u32 %s3860_s21, 4  ;;  %s796_s29 = sshll.u32 %s3862_s23, 4  ;;  %s782_s30 = int_to_ptr.hbm [resolvable:$true] %s781_s30  ;;  %s797_s29 = int_to_ptr.hbm [resolvable:$true] %s796_s29 }
  0x4c   : > { %2588 = dma.hbm_to_vmem [thread:$0]  (!%p3494_p12), %s756_s4, 16, %s758_s3, [#allocation18]  }
  0x4d   : > { %s3300_s5 = smov [#allocation22]   ;;  %s3301_s0 = smov [#allocation23]  }
  0x4e   : > { %s783_s28 = sshll.u32 %s3300_s5, 4  ;;  %s798_s16 = sshll.u32 %s3301_s0, 4  ;;  %s784_s28 = int_to_ptr.vmem [resolvable:$true] %s783_s28  ;;  %s799_s16 = int_to_ptr.vmem [resolvable:$true] %s798_s16 }
  0x4f   : > { %2594 = dma.hbm_to_vmem [thread:$0]  (!%p3494_p12), %s782_s30, 16, %s784_s28, [#allocation21]  }
  0x50   : > { %2597 = dma.hbm_to_vmem [thread:$0]  (!%p3494_p12), %s797_s29, 16, %s799_s16, [#allocation24]  }
  0x51   : > { %826 = sbr.rel (%p3483_p10) target bundleno = 3328 (0xd00), region = 116 }
  0x56   : > { %3235 = dma.done.wait (%p2602_p9), [#allocation3], 128  }
  0x57   : > { %3237 = vsyncadd (%p2602_p9), [#allocation3], 4294967168 }
  0x58   : > { %3239 = dma.done.wait (%p2602_p9), [#allocation6], 384  }
  0x59   : > { %3241 = vsyncadd (%p2602_p9), [#allocation6], 4294966912 }
  0x5a   : > { %3243 = dma.done.wait (%p2602_p9), [#allocation9], 512  }
  0x5b   : > { %3245 = vsyncadd (%p2602_p9), [#allocation9], 4294966784 }
  0x5c   : > { %3247 = dma.done.wait (%p2602_p9), [#allocation12], 272  }
  0x5d   : > { %3249 = vsyncadd (%p2602_p9), [#allocation12], 4294967024 }
  0x5e   : > { %3251 = dma.done.wait (%p2602_p9), [#allocation15], 272  }
  0x5f   : > { %3253 = vsyncadd (%p2602_p9), [#allocation15], 4294967024 }
  0x60   : > { %3255 = dma.done.wait (%p2602_p9), [#allocation18], 272  }
  0x61   : > { %3257 = vsyncadd (%p2602_p9), [#allocation18], 4294967024 }
  0x62   : > { %3259 = dma.done.wait (%p2602_p9), [#allocation21], 272  }
  0x63   : > { %3261 = vsyncadd (%p2602_p9), [#allocation21], 4294967024 }
  0x64   : > { %3263 = dma.done.wait (%p2602_p9), [#allocation24], 16  }
  0x65   : > { %3265 = vsyncadd (%p2602_p9), [#allocation24], 4294967280  ;;  %p962_p13 = scmp.lt.s32.totalorder %s3455_s6, 1  ;;  %s3907_s25 = sld [smem:[#allocation42_spill]]  ;;  %vm977_vm0 = vcmask 261120   ;;  %v3302_v2 = vmov 32.0  }
  0x66   : > { %2726 = vrcp.f32 %v3302_v2  ;;  %s3908_s2 = sld [smem:[#allocation46_spill]]  ;;  %v2476_v18 = vld [vmem:[#allocation7 + $0x8] sm:$0xff]  ;;  %v2475_v19 = vld [vmem:[#allocation7] sm:$0xff]  ;;  %s3303_s10 = smov 120   ;;  %vm1152_vm5 = vcmask 64512   ;;  %vm1280_vm6 = vcmask 1043456  }
  0x67   : > { %s3622_s27 = scalar_select %p962_p13, %s3455_s6, 1  ;;  %v2718_v43 = vld [vmem:[%s3848_s9] ss:$0 sm:$0xff]  ;;  %vm1367_vm7 = vcmask 130048   ;;  %vm1369_vm8 = vcmask 195584  }
  0x68   : > { %s3909_s14 = sld [smem:[#allocation48_spill]]  ;;  %s3304_s24 = smov 104   ;;  %v975_v2 = vld [vmem:[#allocation2] sm:$0xff] }
  0x69   : > { %s2334_s8 = sshll.u32 %s3622_s27, 3  ;;  %s3305_s3 = smov 112  }
  0x6a   : > { %s3306_s1 = smov 8   ;;  %s3307_s29 = smov 16  }
  0x6b   : > { %s965_s18 = scalar_lea.vmem %s3907_s25, %s2334_s8  ;;  %s3910_s8 = sld [smem:[#allocation47_spill]] }
  0x6c   : > { %v972_v0 = vld [vmem:[%s965_s18] sm:$0xff]  ;;  %v2727_v3 = vpop.eup %2726  ;;  %v2472_v14 = vld [vmem:[%s3908_s2 + $0x8] sm:$0xff]  ;;  %s3911_s18 = sld [smem:[#allocation49_spill]]  ;;  %s3308_s5 = smov 24  }
  0x6d   : > { %v978_v1 = vsel %vm977_vm0, %v972_v0, 0.0  ;;  %v982_v4 = vmul.f32 32.0, %v2727_v3  ;;  %vm986_vm1 = vweird.f32 %v2727_v3  ;;  %1037 = vmatpush.bf16.msra.mxu0 %v2472_v14  ;;  %v2471_v16 = vld [vmem:[%s3908_s2] sm:$0xff]  ;;  %s2470_s16 = sshll.u32 %s3622_s27, 4  ;;  %s3912_s25 = sld [smem:[#allocation43_spill]] }
  0x6e   : > { %979 = vadd.xlane.f32.xlu0 %v978_v1  ;;  %v2474_v15 = vld [vmem:[%s3909_s14 + $0x8] sm:$0xff]  ;;  %v2473_v17 = vld [vmem:[%s3909_s14] sm:$0xff] }
  0x6f   : > { %v983_v5 = vsub.f32 1.0, %v982_v4  ;;  %1070 = vmatpush.bf16.msra.mxu2 %v2474_v15 }
  0x71   : > { %v984_v6 = vmul.f32 %v2727_v3, %v983_v5  ;;  %1038 = vmatpush.bf16.msra.mxu0 %v2471_v16  ;;  %v2716_v32 = vld [vmem:[%s3910_s8] ss:$0 sm:$0xff] }
  0x72   : > { %v2717_v35 = vld [vmem:[%s3911_s18] ss:$0 sm:$0xff] }
  0x73   : > { %v985_v7 = vadd.f32 %v2727_v3, %v984_v6  ;;  %1071 = vmatpush.bf16.msra.mxu2 %v2473_v17  ;;  %s970_s18 = scalar_lea.vmem %s3912_s25, %s2470_s16 }
  0x75   : > { %v3629_v8 = vsel %vm986_vm1, %v2727_v3, %v985_v7 }
  0x77   : > { %1103 = vmatpush.bf16.msrb.mxu2 %v2476_v18 }
  0x7b   : > { %1104 = vmatpush.bf16.msrb.mxu2 %v2475_v19 }
  0xe1   : > { %v980_v9 = vpop.xlane.xlu0 %979 }
  0xe2   : > { %v988_v10 = vmul.f32 %v3629_v8, %v980_v9 }
  0xe4   : > { %v989_v11 = vsub.f32 %v972_v0, %v988_v10 }
  0xe6   : > { %v990_v12 = vmul.f32 %v989_v11, %v989_v11 }
  0xe8   : > { %v991_v13 = vsel %vm977_vm0, %v990_v12, 0.0 }
  0xe9   : > { %992 = vadd.xlane.f32.xlu0 %v991_v13 }
 0x15c   : > { %v993_v20 = vpop.xlane.xlu0 %992 }
 0x15d   : > { %v994_v21 = vmul.f32 %v993_v20, %v3629_v8 }
 0x15f   : > { %v995_v22 = vadd.f32 1e-06, %v994_v21 }
 0x161   : > { %2728 = vrsqrt.f32 %v995_v22  ;;  %vm1002_vm3 = vweird.f32 %v995_v22 }
 0x167   : > { %v2729_v23 = vpop.eup %2728 }
 0x168   : > { %v997_v24 = vmul.f32 %v2729_v23, %v995_v22  ;;  %vm1003_vm2 = vweird.f32 %v2729_v23 }
 0x169   : > { %vm1004_vm4 = vmor %vm1002_vm3, %vm1003_vm2 }
 0x16a   : > { %v998_v25 = vmul.f32 %v2729_v23, %v997_v24 }
 0x16c   : > { %v999_v26 = vmul.f32 0.5, %v998_v25 }
 0x16e   : > { %v1000_v27 = vsub.f32 1.5, %v999_v26 }
 0x170   : > { %v1001_v28 = vmul.f32 %v2729_v23, %v1000_v27 }
 0x172   : > { %v1005_v29 = vsel %vm1004_vm4, %v2729_v23, %v1001_v28 }
 0x173   : > { %v3646_v30 = vmul.f32 %v1005_v29, %v989_v11 }
 0x175   : > { %v1007_v31 = vpack.c.bf16 %v3646_v30, %v3646_v30 }
 0x177   : > { %2345 = vmatmul.msk.bf16.vlgmr.msra.gmra.mxu0 %vm977_vm0, %v1007_v31  ;;  %2354 = vmatmul.msk.bf16.vlgmr.msra.gmra.mxu2 %vm977_vm0, %v1007_v31 }
 0x187   : > { %2363 = vmatmul.msk.bf16.vlgmr.msrb.gmra.mxu2 %vm977_vm0, %v1007_v31 }
 0x1f4   : > { %v1040_v33 = vpop.f32.mrf.mxu0 }
 0x1f5   : > { %v1041_v34 = vadd.f32 %v2716_v32, %v1040_v33 }
 0x1f7   : > { %1111 = vrot.lane.b32.xlu0 %v1041_v34, %s3303_s10  ;;  %v1120_v42 = vpack.c.bf16 %v1041_v34, %v1041_v34 }
 0x1fa   : > { %v1073_v36 = vpop.f32.mrf.mxu2 }
 0x1fb   : > { %v1074_v37 = vadd.f32 %v2717_v35, %v1073_v36 }
 0x1fc   : > { %v1042_v38 = vpop.f32.mrf.mxu0 }
 0x1fd   : > { %1125 = vrot.lane.b32.xlu2 %v1074_v37, %s3303_s10  ;;  %1131 = vrot.lane.b32.xlu1 %v1074_v37, %s3304_s24  ;;  %v1134_v39 = vpack.c.bf16 %v1074_v37, %v1074_v37 }
 0x1ff   : > { %v1157_v40 = vsel %vm1152_vm5, %v1134_v39, 0 }
 0x200   : > { %1166 = vmatpush.bf16.xpose.msra.mxu3 %v1157_v40 }
 0x202   : > { %v1075_v41 = vpop.f32.mrf.mxu2 }
 0x205   : > { %1128 = vrot.lane.b32.xlu2 %v1074_v37, %s3305_s3  ;;  %1117 = vrot.lane.b32.xlu1 %v1041_v34, %s3304_s24 }
 0x207   : > { %2364 = vmatmul.msk.bf16.vlgmr.msra.gmra.mxu3 %vm1152_vm5, %v1120_v42 }
 0x20a   : > { %v1106_v44 = vpop.f32.mrf.mxu2 }
 0x20b   : > { %v3669_v45 = vadd.f32 %v2718_v43, %v1106_v44 }
 0x20d   : > { %1114 = vrot.lane.b32.xlu1 %v1041_v34, %s3305_s3  ;;  %v1148_v46 = vpack.c.bf16 %v3669_v45, %v3669_v45 }
 0x20f   : > { %v1282_v47 = vsel %vm1280_vm6, %v1148_v46, 0 }
 0x210   : > { %1291 = vmatpush.bf16.msrb.mxu3 %v1282_v47 }
 0x212   : > { %v1108_v48 = vpop.f32.mrf.mxu2 }
 0x257   : > { %v1126_v49 = vpop.permute.xlu2 %1125 }
 0x258   : > { %v1135_v50 = vpack.c.bf16 %v1126_v49, %v1126_v49 }
 0x25a   : > { %v1176_v51 = vsel %vm1152_vm5, %v1135_v50, 0 }
 0x25b   : > { %1185 = vmatpush.bf16.xpose.msrb.mxu0 %v1176_v51 }
 0x25f   : > { %v1129_v52 = vpop.permute.xlu2 %1128 }
 0x260   : > { %v1136_v53 = vpack.c.bf16 %v1129_v52, %v1129_v52 }
 0x262   : > { %v1195_v54 = vsel %vm1152_vm5, %v1136_v53, 0 }
 0x263   : > { %1204 = vmatpush.bf16.xpose.msra.mxu1 %v1195_v54 }
 0x269   : > { %v1112_v55 = vpop.permute.xlu0 %1111 }
 0x26a   : > { %v1121_v56 = vpack.c.bf16 %v1112_v55, %v1112_v55 }
 0x26c   : > { %2365 = vmatmul.msk.bf16.vlgmr.msrb.gmra.mxu0 %vm1152_vm5, %v1121_v56 }
 0x26f   : > { %v1132_v57 = vpop.permute.xlu1 %1131 }
 0x270   : > { %v1137_v58 = vpack.c.bf16 %v1132_v57, %v1132_v57 }
 0x272   : > { %v1214_v59 = vsel %vm1152_vm5, %v1137_v58, 0 }
 0x273   : > { %1223 = vmatpush.bf16.xpose.msra.mxu2 %v1214_v59 }
 0x277   : > { %v1118_v60 = vpop.permute.xlu1 %1117 }
 0x278   : > { %v1123_v61 = vpack.c.bf16 %v1118_v60, %v1118_v60 }
 0x27a   : > { %2367 = vmatmul.msk.bf16.vlgmr.msra.gmra.mxu2 %vm1152_vm5, %v1123_v61 }
 0x27f   : > { %v1115_v62 = vpop.permute.xlu1 %1114 }
 0x280   : > { %v1122_v63 = vpack.c.bf16 %v1115_v62, %v1115_v62 }
 0x282   : > { %2366 = vmatmul.msk.bf16.vlgmr.msra.gmra.mxu1 %vm1152_vm5, %v1122_v63 }
 0x28a   : > { %v1168_v0 = vpop.f32.mrf.mxu3 }
 0x28b   : > { %v1169_v14 = vadd.f32 %v1168_v0, %v975_v2 }
 0x28d   : > { %v1229_v17 = vsel %vm1152_vm5, %v1169_v14, -inf }
 0x292   : > { %v1170_v1 = vpop.f32.mrf.mxu3 }
 0x2e9   : > { %v1187_v3 = vpop.f32.mrf.mxu0 }
 0x2ea   : > { %v1188_v4 = vadd.f32 %v1187_v3, %v975_v2 }
 0x2ec   : > { %v1232_v5 = vsel %vm1152_vm5, %v1188_v4, -inf }
 0x2ed   : > { %1233 = vmax.xlane.f32.xlu1 %v1232_v5 }
 0x2f1   : > { %v1189_v6 = vpop.f32.mrf.mxu0 }
 0x2fd   : > { %v1225_v7 = vpop.f32.mrf.mxu2 }
 0x2fe   : > { %v1226_v9 = vadd.f32 %v1225_v7, %v975_v2 }
 0x2ff   : > { %v1206_v10 = vpop.f32.mrf.mxu1 }
 0x300   : > { %v1207_v11 = vadd.f32 %v1206_v10, %v975_v2  ;;  %v1238_v12 = vsel %vm1152_vm5, %v1226_v9, -inf  ;;  %v2477_v10 = vld [vmem:[#allocation8] sm:$0xff] }
 0x301   : > { %1239 = vmax.xlane.f32.xlu2 %v1238_v12 }
 0x302   : > { %v1235_v13 = vsel %vm1152_vm5, %v1207_v11, -inf }
 0x303   : > { %1236 = vmax.xlane.f32.xlu0 %v1235_v13 }
 0x305   : > { %v1227_v15 = vpop.f32.mrf.mxu2 }
 0x307   : > { %v1208_v16 = vpop.f32.mrf.mxu1 }
 0x309   : > { %1230 = vmax.xlane.f32.xlu2 %v1229_v17 }
 0x317   : > { %1139 = vrot.lane.b32.xlu0 %v3669_v45, %s3303_s10 }
 0x360   : > { %v1234_v18 = vpop.xlane.xlu1 %1233 }
 0x361   : > { %v1242_v19 = vsub.f32 %v1188_v4, %v1234_v18  ;;  %v2719_v18 = vld [vmem:[%s3850_s11] ss:$0 sm:$0xff] }
 0x363   : > { %v1247_v20 = vmul.f32 1.442695, %v1242_v19 }
 0x365   : > { %2730 = vpow2.f32 %v1247_v20 }
 0x36b   : > { %v2731_v21 = vpop.eup %2730 }
 0x36c   : > { %v1256_v22 = vsel %vm1152_vm5, %v2731_v21, 0.0 }
 0x36d   : > { %1257 = vadd.xlane.f32.xlu1 %v1256_v22 }
 0x374   : > { %v1240_v23 = vpop.xlane.xlu2 %1239 }
 0x375   : > { %v1244_v26 = vsub.f32 %v1226_v9, %v1240_v23  ;;  %v2478_v9 = vld [vmem:[#allocation8 + $0x8] sm:$0xff] }
 0x376   : > { %v1237_v24 = vpop.xlane.xlu0 %1236  ;;  %1401 = vmatpush.bf16.msra.mxu3 %v2478_v9 }
 0x377   : > { %v1243_v25 = vsub.f32 %v1207_v11, %v1237_v24  ;;  %v1251_v28 = vmul.f32 1.442695, %v1244_v26  ;;  %v2482_v24 = vld [vmem:[#allocation11 + $0x8] sm:$0xff] }
 0x378   : > { %v974_v26 = vld [vmem:[%s970_s18 + $0x8] sm:$0xff] }
 0x379   : > { %v1249_v27 = vmul.f32 1.442695, %v1243_v25  ;;  %v973_v25 = vld [vmem:[%s970_s18] sm:$0xff] }
 0x37a   : > { %1402 = vmatpush.bf16.msra.mxu3 %v2477_v10 }
 0x37b   : > { %2732 = vpow2.f32 %v1249_v27  ;;  %v2481_v27 = vld [vmem:[#allocation11] sm:$0xff] }
 0x37c   : > { %v1231_v29 = vpop.xlane.xlu2 %1230  ;;  %2734 = vpow2.f32 %v1251_v28  ;;  %v3718_v28 = vpack.c.bf16 %v974_v26, %v973_v25  ;;  %v2721_v25 = vld [vmem:[%s3852_s13] ss:$0 sm:$0xff] }
 0x37d   : > { %v1241_v31 = vsub.f32 %v1169_v14, %v1231_v29 }
 0x37f   : > { %v1245_v32 = vmul.f32 1.442695, %v1241_v31 }
 0x381   : > { %v2733_v33 = vpop.eup %2732  ;;  %2736 = vpow2.f32 %v1245_v32 }
 0x382   : > { %v1259_v34 = vsel %vm1152_vm5, %v2733_v33, 0.0  ;;  %v2735_v35 = vpop.eup %2734 }
 0x383   : > { %1260 = vadd.xlane.f32.xlu2 %v1259_v34  ;;  %v1262_v40 = vsel %vm1152_vm5, %v2735_v35, 0.0  ;;  %v2480_v34 = vld [vmem:[#allocation10 + $0x8] sm:$0xff] }
 0x386   : > { %1145 = vrot.lane.b32.xlu1 %v3669_v45, %s3304_s24 }
 0x387   : > { %v2737_v36 = vpop.eup %2736 }
 0x388   : > { %v1253_v37 = vsel %vm1152_vm5, %v2737_v36, 0.0 }
 0x389   : > { %v1140_v38 = vpop.permute.xlu0 %1139  ;;  %1254 = vadd.xlane.f32.xlu0 %v1253_v37 }
 0x38a   : > { %v1149_v39 = vpack.c.bf16 %v1140_v38, %v1140_v38 }
 0x38b   : > { %1263 = vadd.xlane.f32.xlu2 %v1262_v40 }
 0x38c   : > { %v1301_v41 = vsel %vm1280_vm6, %v1149_v39, 0 }
 0x38d   : > { %1310 = vmatpush.bf16.msra.mxu0 %v1301_v41 }
 0x391   : > { %1461 = vmatpush.bf16.msrb.mxu0 %v2480_v34 }
 0x3a3   : > { %1142 = vrot.lane.b32.xlu2 %v3669_v45, %s3305_s3 }
 0x3e0   : > { %v1258_v42 = vpop.xlane.xlu1 %1257 }
 0x3e1   : > { %2738 = vrcp.f32 %v1258_v42 }
 0x3e7   : > { %v2739_v43 = vpop.eup %2738 }
 0x3e8   : > { %v1270_v44 = vmul.f32 %v2739_v43, %v2731_v21 }
 0x3ea   : > { %v1274_v46 = vpack.c.bf16 %v1270_v44, %v1270_v44 }
 0x3ec   : > { %2369 = vmatmul.msk.bf16.vlgmr.msra.gmra.mxu0 %vm1152_vm5, %v1274_v46 }
 0x3f6   : > { %v1261_v47 = vpop.xlane.xlu2 %1260 }
 0x3f8   : > { %v1146_v48 = vpop.permute.xlu1 %1145 }
 0x3f9   : > { %v1151_v49 = vpack.c.bf16 %v1146_v48, %v1146_v48 }
 0x3fb   : > { %v1339_v50 = vsel %vm1280_vm6, %v1151_v49, 0 }
 0x3fc   : > { %1348 = vmatpush.bf16.msrb.mxu2 %v1339_v50  ;;  %v1255_v51 = vpop.xlane.xlu0 %1254 }
 0x3fd   : > { %2740 = vrcp.f32 %v1255_v51 }
 0x3fe   : > { %2742 = vrcp.f32 %v1261_v47  ;;  %v1264_v52 = vpop.xlane.xlu2 %1263 }
 0x3ff   : > { %2744 = vrcp.f32 %v1264_v52 }
 0x403   : > { %v2741_v53 = vpop.eup %2740 }
 0x404   : > { %v2743_v45 = vpop.eup %2742  ;;  %v1269_v54 = vmul.f32 %v2741_v53, %v2737_v36  ;;  %v2720_v36 = vld [vmem:[#allocation13] ss:$0 sm:$0xff] }
 0x405   : > { %v2745_v55 = vpop.eup %2744  ;;  %v1271_v59 = vmul.f32 %v2743_v45, %v2733_v33 }
 0x406   : > { %v1272_v56 = vmul.f32 %v2745_v55, %v2735_v35  ;;  %v1143_v57 = vpop.permute.xlu2 %1142  ;;  %v1273_v58 = vpack.c.bf16 %v1269_v54, %v1269_v54  ;;  %v2479_v35 = vld [vmem:[#allocation10] sm:$0xff] }
 0x407   : > { %v1150_v60 = vpack.c.bf16 %v1143_v57, %v1143_v57  ;;  %v1275_v63 = vpack.c.bf16 %v1271_v59, %v1271_v59  ;;  %1462 = vmatpush.bf16.msrb.mxu0 %v2479_v35 }
 0x408   : > { %v1276_v61 = vpack.c.bf16 %v1272_v56, %v1272_v56  ;;  %2368 = vmatmul.msk.bf16.vlgmr.msrb.gmra.mxu3 %vm1152_vm5, %v1273_v58 }
 0x409   : > { %v1320_v62 = vsel %vm1280_vm6, %v1150_v60, 0 }
 0x40a   : > { %1329 = vmatpush.bf16.msrb.mxu1 %v1320_v62  ;;  %2371 = vmatmul.msk.bf16.vlgmr.msrb.gmra.mxu2 %vm1152_vm5, %v1276_v61  ;;  %v2484_v61 = vld [vmem:[#allocation14 + $0x8] sm:$0xff] }
 0x40b   : > { %1532 = vmatpush.bf16.msra.mxu2 %v2484_v61 }
 0x40d   : > { %2370 = vmatmul.msk.bf16.vlgmr.msrb.gmra.mxu1 %vm1152_vm5, %v1275_v63 }
 0x40e   : > { %1498 = vmatpush.bf16.msra.mxu1 %v2482_v24 }
 0x412   : > { %1499 = vmatpush.bf16.msra.mxu1 %v2481_v27 }
 0x41d   : > { %2398 = vmatmul.msk.bf16.vlgmr.msra.gmra.mxu1 %vm977_vm0, %v3718_v28 }
 0x469   : > { %v1312_v0 = vpop.f32.mrf.mxu0 }
 0x46a   : > { %1355 = vrot.lane.b32.xlu1 %v1312_v0, %s3306_s1 }
 0x471   : > { %v1314_v1 = vpop.f32.mrf.mxu0 }
 0x48a   : > { %v1331_v2 = vpop.f32.mrf.mxu1 }
 0x48b   : > { %v1293_v3 = vpop.f32.mrf.mxu3  ;;  %1359 = vrot.lane.b32.xlu2 %v1331_v2, %s3307_s29 }
 0x48d   : > { %v1350_v4 = vpop.f32.mrf.mxu2 }
 0x48e   : > { %1363 = vrot.lane.b32.xlu1 %v1350_v4, %s3308_s5  ;;  %v2483_v4 = vld [vmem:[#allocation14] sm:$0xff] }
 0x48f   : > { %1533 = vmatpush.bf16.msra.mxu2 %v2483_v4 }
 0x492   : > { %v1333_v5 = vpop.f32.mrf.mxu1  ;;  %2407 = vmatmul.msk.bf16.vlgmr.msra.gmra.mxu2 %vm977_vm0, %v3718_v28 }
 0x493   : > { %v1295_v6 = vpop.f32.mrf.mxu3 }
 0x495   : > { %v1352_v7 = vpop.f32.mrf.mxu2 }
 0x49a   : > { %v1501_v37 = vpop.f32.mrf.mxu1 }
 0x49b   : > { %v1502_v38 = vadd.f32 %v2720_v36, %v1501_v37 }
 0x49d   : > { %v1574_v41 = vpack.c.bf16 %v1502_v38, %v1502_v38 }
 0x49f   : > { %v1612_v46 = vunpack.c.l.b16 %v1574_v41 }
 0x4a2   : > { %v1503_v43 = vpop.f32.mrf.mxu1 }
 0x4a3   : > { %v1504_v44 = vadd.f32 %v2720_v36, %v1503_v43 }
 0x4a5   : > { %v2696_v47 = vpack.i.bf16 %v1504_v44, %v1502_v38  ;;  %v1575_v48 = vpack.c.bf16 %v1504_v44, %v1504_v44 }
 0x4a7   : > { %v1613_v49 = vunpack.c.l.b16 %v1575_v48  ;;  %2687 = vrot.lane.b32.xlu0 %v2696_v47, %s3304_s24 }
 0x4a9   : > { %v1614_v50 = vpack.c.b16 %v1613_v49, %v1612_v46 }
 0x4ab   : > { %v1619_v53 = vsel %vm1152_vm5, %v1614_v50, 0  ;;  %v976_v50 = vld [vmem:[#allocation5] sm:$0xff] }
 0x4ac   : > { %1628 = vmatpush.bf16.xpose.msrb.mxu3 %v1619_v53 }
 0x4dc   : > { %v1356_v11 = vpop.permute.xlu1 %1355 }
 0x4dd   : > { %v1366_v13 = vsel %vm1152_vm5, %v1293_v3, %v1356_v11 }
 0x4e5   : > { %v1360_v12 = vpop.permute.xlu2 %1359 }
 0x4e6   : > { %v1368_v14 = vsel %vm1367_vm7, %v1366_v13, %v1360_v12 }
 0x500   : > { %v1364_v15 = vpop.permute.xlu1 %1363 }
 0x501   : > { %v1370_v16 = vsel %vm1369_vm8, %v1368_v14, %v1364_v15 }
 0x502   : > { %v1371_v17 = vpack.c.bf16 %v1370_v16, %v1370_v16 }
 0x504   : > { %2380 = vmatmul.msk.bf16.vlgmr.msra.gmra.mxu3 %vm977_vm0, %v1371_v17 }
 0x519   : > { %v2688_v3 = vpop.permute.xlu0 %2687 }
 0x51a   : > { %v2690_v5 = vunpack.i.h.bf16 %v2688_v3  ;;  %v2689_v6 = vunpack.i.l.bf16 %v2688_v3 }
 0x51c   : > { %v1581_v12 = vpack.c.bf16 %v2690_v5, %v2690_v5  ;;  %v1580_v13 = vpack.c.bf16 %v2689_v6, %v2689_v6 }
 0x587   : > { %v1404_v19 = vpop.f32.mrf.mxu3 }
 0x588   : > { %v1405_v20 = vadd.f32 %v2719_v18, %v1404_v19  ;;  %v1685_v18 = vunpack.c.l.b16 %v1581_v12  ;;  %v1684_v19 = vunpack.c.l.b16 %v1580_v13 }
 0x58a   : > { %v1408_v21 = vadd.f32 %v1405_v20, %v3646_v30 }
 0x58c   : > { %v1409_v22 = vsel %vm977_vm0, %v1408_v21, 0.0 }
 0x58d   : > { %1410 = vadd.xlane.f32.xlu2 %v1409_v22  ;;  %v1686_v22 = vpack.c.b16 %v1685_v18, %v1684_v19 }
 0x58f   : > { %v1406_v23 = vpop.f32.mrf.mxu3  ;;  %v1691_v26 = vsel %vm1152_vm5, %v1686_v22, 0 }
 0x590   : > { %1700 = vmatpush.bf16.xpose.msrb.mxu2 %v1691_v26 }
 0x5a5   : > { %2692 = vrot.lane.b32.xlu2 %v2696_v47, %s3303_s10 }
 0x600   : > { %v1411_v30 = vpop.xlane.xlu2 %1410 }
 0x601   : > { %v1412_v29 = vmul.f32 %v1411_v30, %v3629_v8 }
 0x603   : > { %v1413_v31 = vsub.f32 %v1408_v21, %v1412_v29 }
 0x605   : > { %v1414_v32 = vmul.f32 %v1413_v31, %v1413_v31 }
 0x607   : > { %v1415_v33 = vsel %vm977_vm0, %v1414_v32, 0.0 }
 0x608   : > { %1416 = vadd.xlane.f32.xlu1 %v1415_v33  ;;  %v2693_v60 = vpop.permute.xlu2 %2692 }
 0x609   : > { %v2695_v63 = vunpack.i.h.bf16 %v2693_v60  ;;  %v2694_v0 = vunpack.i.l.bf16 %v2693_v60 }
 0x60b   : > { %v1577_v7 = vpack.c.bf16 %v2695_v63, %v2695_v63  ;;  %v1576_v9 = vpack.c.bf16 %v2694_v0, %v2694_v0 }
 0x60d   : > { %v1637_v14 = vunpack.c.l.b16 %v1577_v7  ;;  %v1636_v15 = vunpack.c.l.b16 %v1576_v9 }
 0x60f   : > { %v1638_v20 = vpack.c.b16 %v1637_v14, %v1636_v15 }
 0x611   : > { %v1643_v23 = vsel %vm1152_vm5, %v1638_v20, 0 }
 0x612   : > { %1652 = vmatpush.bf16.xpose.msra.mxu0 %v1643_v23 }
 0x621   : > { %2697 = vrot.lane.b32.xlu1 %v2696_v47, %s3305_s3 }
 0x67b   : > { %v1417_v39 = vpop.xlane.xlu1 %1416 }
 0x67c   : > { %v1418_v40 = vmul.f32 %v1417_v39, %v3629_v8  ;;  %v1535_v39 = vpop.f32.mrf.mxu2 }
 0x67e   : > { %v1419_v42 = vadd.f32 1e-06, %v1418_v40  ;;  %v2722_v40 = vld [vmem:[#allocation16] ss:$0 sm:$0xff] }
 0x680   : > { %2746 = vrsqrt.f32 %v1419_v42  ;;  %vm1426_vm10 = vweird.f32 %v1419_v42 }
 0x684   : > { %v1537_v41 = vpop.f32.mrf.mxu2 }
 0x685   : > { %v1538_v43 = vadd.f32 %v2722_v40, %v1537_v41 }
 0x686   : > { %v2747_v51 = vpop.eup %2746 }
 0x687   : > { %v1421_v52 = vmul.f32 %v2747_v51, %v1419_v42  ;;  %vm1427_vm9 = vweird.f32 %v2747_v51  ;;  %v1536_v42 = vadd.f32 %v2722_v40, %v1535_v39  ;;  %v1603_v46 = vpack.c.bf16 %v1538_v43, %v1538_v43 }
 0x688   : > { %vm1428_vm11 = vmor %vm1426_vm10, %vm1427_vm9 }
 0x689   : > { %v1422_v45 = vmul.f32 %v2747_v51, %v1421_v52  ;;  %v1602_v44 = vpack.c.bf16 %v1536_v42, %v1536_v42  ;;  %v1757_v48 = vunpack.c.l.b16 %v1603_v46 }
 0x68b   : > { %v1423_v54 = vmul.f32 0.5, %v1422_v45  ;;  %v1756_v47 = vunpack.c.l.b16 %v1602_v44 }
 0x68d   : > { %v1424_v55 = vsub.f32 1.5, %v1423_v54  ;;  %v1758_v49 = vpack.c.b16 %v1757_v48, %v1756_v47 }
 0x68f   : > { %v1425_v56 = vmul.f32 %v2747_v51, %v1424_v55  ;;  %1770 = vmatpush.bf16.msra.mxu3 %v1758_v49 }
 0x691   : > { %v1429_v57 = vsel %vm1428_vm11, %v2747_v51, %v1425_v56 }
 0x692   : > { %v3729_v58 = vmul.f32 %v1429_v57, %v1413_v31 }
 0x693   : > { %v2698_v62 = vpop.permute.xlu1 %2697 }
 0x694   : > { %v1431_v59 = vpack.c.bf16 %v3729_v58, %v3729_v58  ;;  %v2700_v1 = vunpack.i.h.bf16 %v2698_v62  ;;  %v2699_v2 = vunpack.i.l.bf16 %v2698_v62 }
 0x696   : > { %2389 = vmatmul.msk.bf16.vlgmr.msrb.gmra.mxu0 %vm977_vm0, %v1431_v59  ;;  %v1579_v10 = vpack.c.bf16 %v2700_v1, %v2700_v1  ;;  %v1578_v11 = vpack.c.bf16 %v2699_v2, %v2699_v2  ;;  %v2701_v1 = vpack.i.bf16 %v1538_v43, %v1536_v42 }
 0x698   : > { %v1661_v16 = vunpack.c.l.b16 %v1579_v10  ;;  %v1660_v17 = vunpack.c.l.b16 %v1578_v11 }
 0x69a   : > { %v1662_v21 = vpack.c.b16 %v1661_v16, %v1660_v17 }
 0x69c   : > { %v1667_v24 = vsel %vm1152_vm5, %v1662_v21, 0 }
 0x69d   : > { %1676 = vmatpush.bf16.xpose.msrb.mxu1 %v1667_v24 }
 0x713   : > { %v1464_v27 = vpop.f32.mrf.mxu0 }
 0x714   : > { %v1465_v30 = vadd.f32 %v2721_v25, %v1464_v27 }
 0x716   : > { %v1550_v29 = vpack.c.bf16 %v1465_v30, %v1465_v30  ;;  %1547 = vrot.lane.b32.xlu0 %v1465_v30, %s3304_s24 }
 0x718   : > { %2408 = vmatmul.msk.bf16.vlgmr.msrb.gmra.mxu3 %vm1152_vm5, %v1550_v29 }
 0x71b   : > { %v1466_v31 = vpop.f32.mrf.mxu0 }
 0x71e   : > { %1541 = vrot.lane.b32.xlu0 %v1465_v30, %s3303_s10 }
 0x726   : > { %1544 = vrot.lane.b32.xlu0 %v1465_v30, %s3305_s3 }
 0x788   : > { %v1548_v28 = vpop.permute.xlu0 %1547 }
 0x789   : > { %v1553_v32 = vpack.c.bf16 %v1548_v28, %v1548_v28 }
 0x78b   : > { %2411 = vmatmul.msk.bf16.vlgmr.msrb.gmra.mxu2 %vm1152_vm5, %v1553_v32 }
 0x790   : > { %v1542_v33 = vpop.permute.xlu0 %1541 }
 0x791   : > { %v1551_v34 = vpack.c.bf16 %v1542_v33, %v1542_v33 }
 0x793   : > { %2409 = vmatmul.msk.bf16.vlgmr.msra.gmra.mxu0 %vm1152_vm5, %v1551_v34 }
 0x798   : > { %v1545_v35 = vpop.permute.xlu0 %1544 }
 0x799   : > { %v1552_v36 = vpack.c.bf16 %v1545_v35, %v1545_v35 }
 0x79b   : > { %v1630_v37 = vpop.f32.mrf.mxu3  ;;  %2410 = vmatmul.msk.bf16.vlgmr.msrb.gmra.mxu1 %vm1152_vm5, %v1552_v36 }
 0x79c   : > { %v1631_v56 = vadd.f32 %v1630_v37, %v976_v50 }
 0x79e   : > { %v1706_v62 = vsel %vm1367_vm7, %v1631_v56, -inf }
 0x7a3   : > { %v1632_v38 = vpop.f32.mrf.mxu3 }
 0x80e   : > { %v1702_v51 = vpop.f32.mrf.mxu2 }
 0x80f   : > { %v1703_v52 = vadd.f32 %v1702_v51, %v976_v50 }
 0x810   : > { %v1654_v53 = vpop.f32.mrf.mxu0 }
 0x811   : > { %v1655_v45 = vadd.f32 %v1654_v53, %v976_v50  ;;  %v1715_v54 = vsel %vm1367_vm7, %v1703_v52, -inf }
 0x812   : > { %1716 = vmax.xlane.f32.xlu2 %v1715_v54 }
 0x813   : > { %v1709_v55 = vsel %vm1367_vm7, %v1655_v45, -inf }
 0x814   : > { %1710 = vmax.xlane.f32.xlu1 %v1709_v55 }
 0x816   : > { %v1704_v57 = vpop.f32.mrf.mxu2 }
 0x818   : > { %v1656_v59 = vpop.f32.mrf.mxu0  ;;  %v1678_v60 = vpop.f32.mrf.mxu1 }
 0x819   : > { %v1679_v61 = vadd.f32 %v1678_v60, %v976_v50 }
 0x81a   : > { %1707 = vmax.xlane.f32.xlu2 %v1706_v62 }
 0x81b   : > { %v1712_v63 = vsel %vm1367_vm7, %v1679_v61, -inf }
 0x81c   : > { %1713 = vmax.xlane.f32.xlu0 %v1712_v63 }
 0x820   : > { %v1680_v0 = vpop.f32.mrf.mxu1 }
 0x830   : > { %2702 = vrot.lane.b32.xlu0 %v2701_v1, %s3304_s24 }
 0x885   : > { %v1717_v2 = vpop.xlane.xlu2 %1716 }
 0x886   : > { %v1721_v13 = vsub.f32 %v1703_v52, %v1717_v2 }
 0x887   : > { %v1711_v3 = vpop.xlane.xlu1 %1710 }
 0x888   : > { %v1719_v4 = vsub.f32 %v1655_v45, %v1711_v3  ;;  %v1728_v16 = vmul.f32 1.442695, %v1721_v13 }
 0x88a   : > { %v1724_v5 = vmul.f32 1.442695, %v1719_v4 }
 0x88c   : > { %2748 = vpow2.f32 %v1724_v5 }
 0x88d   : > { %v1708_v6 = vpop.xlane.xlu2 %1707 }
 0x88e   : > { %v1718_v7 = vsub.f32 %v1631_v56, %v1708_v6 }
 0x88f   : > { %v1714_v9 = vpop.xlane.xlu0 %1713 }
 0x890   : > { %v1722_v10 = vmul.f32 1.442695, %v1718_v7  ;;  %v1720_v11 = vsub.f32 %v1679_v61, %v1714_v9  ;;  %v2486_v9 = vld [vmem:[#allocation17 + $0x8] sm:$0xff] }
 0x891   : > { %1887 = vmatpush.bf16.msrb.mxu3 %v2486_v9 }
 0x892   : > { %v2749_v12 = vpop.eup %2748  ;;  %2750 = vpow2.f32 %v1722_v10  ;;  %v1726_v14 = vmul.f32 1.442695, %v1720_v11  ;;  %v2485_v10 = vld [vmem:[#allocation17] sm:$0xff] }
 0x893   : > { %v1733_v15 = vsel %vm1367_vm7, %v2749_v12, 0.0 }
 0x894   : > { %2752 = vpow2.f32 %v1726_v14  ;;  %1734 = vadd.xlane.f32.xlu2 %v1733_v15 }
 0x895   : > { %2754 = vpow2.f32 %v1728_v16  ;;  %1888 = vmatpush.bf16.msrb.mxu3 %v2485_v10 }
 0x898   : > { %v2751_v17 = vpop.eup %2750 }
 0x899   : > { %v1730_v18 = vsel %vm1367_vm7, %v2751_v17, 0.0 }
 0x89a   : > { %v2753_v19 = vpop.eup %2752  ;;  %1731 = vadd.xlane.f32.xlu0 %v1730_v18  ;;  %v2723_v18 = vld [vmem:[#allocation19] ss:$0 sm:$0xff] }
 0x89b   : > { %v1736_v20 = vsel %vm1367_vm7, %v2753_v19, 0.0  ;;  %v2755_v21 = vpop.eup %2754 }
 0x89c   : > { %1737 = vadd.xlane.f32.xlu1 %v1736_v20  ;;  %v1739_v25 = vsel %vm1367_vm7, %v2755_v21, 0.0 }
 0x8a2   : > { %v2703_v22 = vpop.permute.xlu0 %2702 }
 0x8a3   : > { %v2705_v23 = vunpack.i.h.bf16 %v2703_v22  ;;  %v2704_v24 = vunpack.i.l.bf16 %v2703_v22 }
 0x8a4   : > { %1740 = vadd.xlane.f32.xlu1 %v1739_v25 }
 0x8a5   : > { %v1609_v26 = vpack.c.bf16 %v2705_v23, %v2705_v23  ;;  %v1608_v27 = vpack.c.bf16 %v2704_v24, %v2704_v24 }
 0x8a7   : > { %v1823_v30 = vunpack.c.l.b16 %v1609_v26  ;;  %v1822_v29 = vunpack.c.l.b16 %v1608_v27 }
 0x8a9   : > { %v1824_v31 = vpack.c.b16 %v1823_v30, %v1822_v29  ;;  %v2488_v29 = vld [vmem:[#allocation20 + $0x8] sm:$0xff] }
 0x8ab   : > { %1836 = vmatpush.bf16.msra.mxu2 %v1824_v31  ;;  %v2487_v31 = vld [vmem:[#allocation20] sm:$0xff] }
 0x8ac   : > { %2707 = vrot.lane.b32.xlu2 %v2701_v1, %s3303_s10  ;;  %s959_s10 = sand.u32 1, %s3276_s26  }
 0x8ad   : > { %s2333_s24 = sshll.u32 %s959_s10, 3  ;;  %s2079_s4 = scalar_lea.sflag [#allocation4], %s959_s10 }
 0x8ae   : > { %s961_s0 = scalar_lea.vmem [#allocation25], %s2333_s24 }
 0x8af   : > { %s2091_s16 = sshll.u32 %s961_s0, 4  ;;  %s2092_s16 = int_to_ptr.vmem [resolvable:$true] %s2091_s16 }
 0x8bd   : > { %2712 = vrot.lane.b32.xlu1 %v2701_v1, %s3305_s3  ;;  %s2467_s3 = sshll.u32 %s3455_s6, 3 }
 0x907   : > { %v1735_v28 = vpop.xlane.xlu2 %1734 }
 0x908   : > { %2756 = vrcp.f32 %v1735_v28 }
 0x90d   : > { %v1732_v32 = vpop.xlane.xlu0 %1731 }
 0x90e   : > { %2758 = vrcp.f32 %v1732_v32  ;;  %v2757_v37 = vpop.eup %2756 }
 0x90f   : > { %v1738_v33 = vpop.xlane.xlu1 %1737  ;;  %v2708_v34 = vpop.permute.xlu2 %2707  ;;  %v1747_v43 = vmul.f32 %v2757_v37, %v2749_v12 }
 0x910   : > { %v2710_v35 = vunpack.i.h.bf16 %v2708_v34  ;;  %v2709_v36 = vunpack.i.l.bf16 %v2708_v34 }
 0x911   : > { %v1751_v49 = vpack.c.bf16 %v1747_v43, %v1747_v43  ;;  %v2495_v43 = vld [vmem:[%s3861_s22 + $0x30] sm:$0xff] }
 0x912   : > { %v1605_v38 = vpack.c.bf16 %v2710_v35, %v2710_v35  ;;  %v1604_v39 = vpack.c.bf16 %v2709_v36, %v2709_v36 }
 0x914   : > { %v2759_v40 = vpop.eup %2758  ;;  %v1779_v41 = vunpack.c.l.b16 %v1605_v38  ;;  %v1778_v42 = vunpack.c.l.b16 %v1604_v39 }
 0x915   : > { %v1746_v44 = vmul.f32 %v2759_v40, %v2751_v17 }
 0x916   : > { %v1780_v46 = vpack.c.b16 %v1779_v41, %v1778_v42  ;;  %v2724_v42 = vld [vmem:[#allocation22] ss:$0 sm:$0xff] }
 0x917   : > { %v1750_v47 = vpack.c.bf16 %v1746_v44, %v1746_v44  ;;  %v1741_v48 = vpop.xlane.xlu1 %1740 }
 0x918   : > { %2760 = vrcp.f32 %v1741_v48  ;;  %1792 = vmatpush.bf16.msrb.mxu0 %v1780_v46  ;;  %v2494_v48 = vld [vmem:[%s3861_s22 + $0x28] sm:$0xff] }
 0x919   : > { %2412 = vmatmul.msk.bf16.vlgmr.msra.gmra.mxu3 %vm1367_vm7, %v1750_v47  ;;  %2762 = vrcp.f32 %v1738_v33 }
 0x91b   : > { %2413 = vmatmul.msk.bf16.vlgmr.msrb.gmra.mxu0 %vm1367_vm7, %v1751_v49 }
 0x91c   : > { %1947 = vmatpush.bf16.msra.mxu0 %v2488_v29 }
 0x91e   : > { %v2761_v50 = vpop.eup %2760 }
 0x91f   : > { %v1749_v51 = vmul.f32 %v2761_v50, %v2755_v21  ;;  %v2763_v55 = vpop.eup %2762 }
 0x920   : > { %v1748_v61 = vmul.f32 %v2763_v55, %v2753_v19  ;;  %1948 = vmatpush.bf16.msra.mxu0 %v2487_v31 }
 0x921   : > { %v1753_v52 = vpack.c.bf16 %v1749_v51, %v1749_v51  ;;  %v2493_v51 = vld [vmem:[%s3861_s22 + $0x20] sm:$0xff] }
 0x922   : > { %v1752_v63 = vpack.c.bf16 %v1748_v61, %v1748_v61 }
 0x923   : > { %2415 = vmatmul.msk.bf16.vlgmr.msra.gmra.mxu2 %vm1367_vm7, %v1753_v52 }
 0x92f   : > { %v2713_v53 = vpop.permute.xlu1 %2712 }
 0x930   : > { %v2715_v45 = vunpack.i.h.bf16 %v2713_v53  ;;  %v2714_v54 = vunpack.i.l.bf16 %v2713_v53 }
 0x932   : > { %v1607_v56 = vpack.c.bf16 %v2715_v45, %v2715_v45  ;;  %v1606_v57 = vpack.c.bf16 %v2714_v54, %v2714_v54  ;;  %v2492_v45 = vld [vmem:[%s3861_s22 + $0x18] sm:$0xff]  ;;  %v2491_v54 = vld [vmem:[%s3861_s22 + $0x10] sm:$0xff] }
 0x934   : > { %v1801_v59 = vunpack.c.l.b16 %v1607_v56  ;;  %v1800_v60 = vunpack.c.l.b16 %v1606_v57  ;;  %v2490_v57 = vld [vmem:[%s3861_s22 + $0x8] sm:$0xff] }
 0x936   : > { %v1802_v62 = vpack.c.b16 %v1801_v59, %v1800_v60 }
 0x938   : > { %1814 = vmatpush.bf16.msra.mxu1 %v1802_v62 }
 0x93b   : > { %2414 = vmatmul.msk.bf16.vlgmr.msra.gmra.mxu1 %vm1367_vm7, %v1752_v63  ;;  %v2489_v63 = vld [vmem:[%s3861_s22] sm:$0xff] }
 0x998   : > { %v1794_v0 = vpop.f32.mrf.mxu0 }
 0x999   : > { %1843 = vrot.lane.b32.xlu2 %v1794_v0, %s3306_s1 }
 0x99c   : > { %v1772_v1 = vpop.f32.mrf.mxu3 }
 0x9a0   : > { %v1796_v2 = vpop.f32.mrf.mxu0 }
 0x9a4   : > { %v1774_v3 = vpop.f32.mrf.mxu3 }
 0x9a6   : > { %v1838_v4 = vpop.f32.mrf.mxu2 }
 0x9a7   : > { %1851 = vrot.lane.b32.xlu2 %v1838_v4, %s3308_s5 }
 0x9ae   : > { %v1840_v5 = vpop.f32.mrf.mxu2 }
 0x9b8   : > { %v1816_v6 = vpop.f32.mrf.mxu1 }
 0x9b9   : > { %1847 = vrot.lane.b32.xlu1 %v1816_v6, %s3307_s29  ;;  %s3913_s29 = sld [smem:[#allocation55_spill]] }
 0x9bf   : > { %s2089_s28 = scalar_lea.hbm %s3913_s29, %s2467_s3  ;;  %s3210_s7 = scalar_lea.hbm %s3913_s29, 16 }
 0x9c0   : > { %v1818_v7 = vpop.f32.mrf.mxu1  ;;  %s2093_s8 = sshll.u32 %s2089_s28, 4  ;;  %s2094_s8 = int_to_ptr.hbm [resolvable:$true] %s2093_s8 }
 0x9c1   : > { %s3204_s25 = sshra.s32 %s2094_s8, 4  ;;  %s3205_s25 = int_to_ptr.hbm [resolvable:$true] %s3204_s25 }
 0x9c2   : > { %s3206_s6 = scalar_lea.hbm %s3205_s25, 8  ;;  %p3211_p3 = scmp.lt.s32.totalorder %s3205_s25, %s3913_s29 }
 0x9c3   : > { %p3207_p0 = scmp.ne.s32.totalorder %s3205_s25, %s3206_s6  ;;  %p3212_p4 = scmp.lt.s32.totalorder %s3210_s7, %s3206_s6 }
 0x9c5   : > { %p3208_p1 = pnand %p3207_p0, %p3472_p5  ;;  %p3213_p7 = por %p3212_p4, %p3211_p3 }
 0x9c7   : > { %p3209_p2 = pneg %p3208_p1 }
 0x9c9   : > { %p3214_p8 = pnand %p3213_p7, %p3209_p2 }
 0x9f3   : > { %v1844_v11 = vpop.permute.xlu2 %1843 }
 0x9f4   : > { %v1854_v12 = vsel %vm1152_vm5, %v1772_v1, %v1844_v11 }
 0xa01   : > { %v1852_v14 = vpop.permute.xlu2 %1851 }
 0xa2b   : > { %v1848_v13 = vpop.permute.xlu1 %1847 }
 0xa2c   : > { %v1855_v15 = vsel %vm1367_vm7, %v1854_v12, %v1848_v13 }
 0xa2d   : > { %v1856_v16 = vsel %vm1369_vm8, %v1855_v15, %v1852_v14 }
 0xa2e   : > { %v1857_v17 = vpack.c.bf16 %v1856_v16, %v1856_v16 }
 0xa30   : > { %2424 = vmatmul.msk.bf16.vlgmr.msrb.gmra.mxu3 %vm977_vm0, %v1857_v17 }
 0xab3   : > { %v1890_v19 = vpop.f32.mrf.mxu3 }
 0xab4   : > { %v1891_v20 = vadd.f32 %v2723_v18, %v1890_v19 }
 0xab6   : > { %v3772_v21 = vadd.f32 %v1891_v20, %v3729_v58 }
 0xab8   : > { %v1895_v22 = vsel %vm977_vm0, %v3772_v21, 0.0 }
 0xab9   : > { %1896 = vadd.xlane.f32.xlu1 %v1895_v22 }
 0xabb   : > { %v1892_v23 = vpop.f32.mrf.mxu3 }
 0xb2c   : > { %v1897_v24 = vpop.xlane.xlu1 %1896 }
 0xb2d   : > { %v1898_v25 = vmul.f32 %v1897_v24, %v3629_v8 }
 0xb2f   : > { %v1899_v26 = vsub.f32 %v3772_v21, %v1898_v25 }
 0xb31   : > { %v1900_v27 = vmul.f32 %v1899_v26, %v1899_v26 }
 0xb33   : > { %v1901_v30 = vsel %vm977_vm0, %v1900_v27, 0.0  ;;  %v2725_v27 = vld [vmem:[#allocation23] ss:$0 sm:$0xff] }
 0xb34   : > { %1902 = vadd.xlane.f32.xlu2 %v1901_v30 }
 0xba7   : > { %v1903_v58 = vpop.xlane.xlu2 %1902 }
 0xba8   : > { %v1904_v28 = vmul.f32 %v1903_v58, %v3629_v8  ;;  %v2496_v8 = vld [vmem:[%s3861_s22 + $0x38] sm:$0xff] }
 0xba9   : > { %2063 = vmatpush.bf16.msrb.mxu1 %v2496_v8 }
 0xbaa   : > { %v1905_v32 = vadd.f32 1e-06, %v1904_v28 }
 0xbac   : > { %2764 = vrsqrt.f32 %v1905_v32  ;;  %vm1912_vm13 = vweird.f32 %v1905_v32 }
 0xbad   : > { %2064 = vmatpush.bf16.msrb.mxu1 %v2495_v43 }
 0xbb1   : > { %2065 = vmatpush.bf16.msrb.mxu1 %v2494_v48 }
 0xbb2   : > { %v2765_v33 = vpop.eup %2764 }
 0xbb3   : > { %v1907_v34 = vmul.f32 %v2765_v33, %v1905_v32  ;;  %vm1913_vm12 = vweird.f32 %v2765_v33 }
 0xbb4   : > { %vm1914_vm14 = vmor %vm1912_vm13, %vm1913_vm12 }
 0xbb5   : > { %v1908_v35 = vmul.f32 %v2765_v33, %v1907_v34  ;;  %2066 = vmatpush.bf16.msrb.mxu1 %v2493_v51 }
 0xbb7   : > { %v1909_v36 = vmul.f32 0.5, %v1908_v35 }
 0xbb9   : > { %v1910_v37 = vsub.f32 1.5, %v1909_v36  ;;  %2067 = vmatpush.bf16.msrb.mxu1 %v2492_v45 }
 0xbbb   : > { %v1911_v38 = vmul.f32 %v2765_v33, %v1910_v37 }
 0xbbd   : > { %v1915_v39 = vsel %vm1914_vm14, %v2765_v33, %v1911_v38  ;;  %2068 = vmatpush.bf16.msrb.mxu1 %v2491_v54 }
 0xbbe   : > { %v1916_v40 = vmul.f32 %v1915_v39, %v1899_v26 }
 0xbc0   : > { %v1917_v41 = vpack.c.bf16 %v1916_v40, %v1916_v40 }
 0xbc1   : > { %2069 = vmatpush.bf16.msrb.mxu1 %v2490_v57 }
 0xbc2   : > { %2433 = vmatmul.msk.bf16.vlgmr.msra.gmra.mxu0 %vm977_vm0, %v1917_v41 }
 0xbc5   : > { %2070 = vmatpush.bf16.msrb.mxu1 %v2489_v63 }
 0xc3f   : > { %v1950_v44 = vpop.f32.mrf.mxu0 }
 0xc40   : > { %v1951_v46 = vadd.f32 %v2724_v42, %v1950_v44 }
 0xc42   : > { %v1954_v47 = vmul.f32 0.70710677, %v1951_v46  ;;  %v1991_v23 = vmul.f32 0.5, %v1951_v46 }
 0xc44   : > { %v1955_v49 = vand.u32 2147483647, %v1954_v47  ;;  %vm1988_vm4 = vcmp.ge.f32.partialorder %v1954_v47, 0.0 }
 0xc46   : > { %v1956_v50 = vmul.f32 0.3275911, %v1955_v49  ;;  %v1982_v4 = vmul.f32 %v1955_v49, %v1955_v49 }
 0xc47   : > { %v1952_v52 = vpop.f32.mrf.mxu0 }
 0xc48   : > { %v1957_v53 = vadd.f32 1.0, %v1956_v50  ;;  %v1983_v7 = vsub.f32 0.0, %v1982_v4 }
 0xc4a   : > { %2766 = vrcp.f32 %v1957_v53  ;;  %v1969_v60 = vand.u32 2147483648, %v1957_v53  ;;  %v1967_v62 = vand.u32 2147483647, %v1957_v53  ;;  %vm1963_vm1 = vweird.f32 %v1957_v53 }
 0xc4b   : > { %v1984_v11 = vmul.f32 1.442695, %v1983_v7 }
 0xc4c   : > { %v1970_v1 = vor.u32 1.1754944e-38, %v1969_v60  ;;  %vm1968_vm3 = vcmp.eq.f32.partialorder %v1967_v62, 8.507059e+37 }
 0xc4d   : > { %2768 = vpow2.f32 %v1984_v11 }
 0xc50   : > { %v2767_v55 = vpop.eup %2766 }
 0xc51   : > { %v1959_v56 = vmul.f32 %v2767_v55, %v1957_v53  ;;  %vm1964_vm15 = vweird.f32 %v2767_v55 }
 0xc52   : > { %vm1965_vm2 = vmor %vm1963_vm1, %vm1964_vm15 }
 0xc53   : > { %v1960_v59 = vsub.f32 1.0, %v1959_v56  ;;  %v2769_v17 = vpop.eup %2768 }
 0xc55   : > { %v1961_v61 = vmul.f32 %v2767_v55, %v1960_v59 }
 0xc57   : > { %v1962_v0 = vadd.f32 %v2767_v55, %v1961_v61 }
 0xc59   : > { %v1966_v2 = vsel %vm1965_vm2, %v2767_v55, %v1962_v0 }
 0xc5a   : > { %v1971_v3 = vsel %vm1968_vm3, %v1970_v1, %v1966_v2 }
 0xc5b   : > { %v1973_v5 = vmul.f32 1.0614054, %v1971_v3 }
 0xc5d   : > { %v1974_v6 = vadd.f32 -1.4531521, %v1973_v5 }
 0xc5f   : > { %v1975_v9 = vmul.f32 %v1974_v6, %v1971_v3 }
 0xc61   : > { %v1976_v10 = vadd.f32 1.4214138, %v1975_v9 }
 0xc63   : > { %v1977_v12 = vmul.f32 %v1976_v10, %v1971_v3 }
 0xc65   : > { %v1978_v13 = vadd.f32 -0.28449672, %v1977_v12 }
 0xc67   : > { %v1979_v14 = vmul.f32 %v1978_v13, %v1971_v3 }
 0xc69   : > { %v1980_v15 = vadd.f32 0.2548296, %v1979_v14 }
 0xc6b   : > { %v1981_v16 = vmul.f32 %v1980_v15, %v1971_v3 }
 0xc6d   : > { %v1986_v18 = vmul.f32 %v2769_v17, %v1981_v16 }
 0xc6f   : > { %v1987_v19 = vsub.f32 1.0, %v1986_v18 }
 0xc71   : > { %v1989_v20 = vsub.f32 0.0, %v1987_v19 }
 0xc73   : > { %v1990_v22 = vsel %vm1988_vm4, %v1987_v19, %v1989_v20 }
 0xc74   : > { %v1992_v24 = vadd.f32 1.0, %v1990_v22 }
 0xc76   : > { %v1993_v25 = vmul.f32 %v1992_v24, %v1991_v23 }
 0xc78   : > { %v1994_v26 = vpack.c.bf16 %v1993_v25, %v1993_v25 }
 0xc7a   : > { %2071 = vmatmul.bf16.vlgmr.msrb.gmra.mxu1 %v1994_v26 }
 0xcf7   : > { %v2072_v30 = vpop.f32.mrf.mxu1 }
 0xcf8   : > { %v2073_v29 = vadd.f32 %v2725_v27, %v2072_v30 }
 0xcfa   : > { %v2076_v31 = vadd.f32 %v2073_v29, %v3772_v21 }
 0xcfc   : > { %2077 = vst.msk [vmem:[%s961_s0] sm:$0xff] %vm977_vm0, %v2076_v31 }
 0xcfd   : > { %3217 = shalt.err (!%p3214_p8)
}
 0xcfe   : > { %2553 = dma.vmem_to_hbm [thread:$0]  (%p3472_p5), %s2092_s16, 128, %s2094_s8, %s2079_s4  }
 0xcff   : > { %v2074_v21 = vpop.f32.mrf.mxu1 }
 0xd00 PF: > { %s3915_s10 = sld [smem:[#allocation37_spill]] }
 0xd01   : > { %s3916_s30 = sld [smem:[#allocation35_spill]] }
 0xd06   : > { %p2630_p9 = scmp.ge.s32.totalorder %s3915_s10, 2 }
 0xd07   : > { %s2105_s28 = sand.u32 1, %s3916_s30  }
 0xd08   : > { %p2599_p10 = pnand %p2630_p9, %p3476_p6  ;;  %s2106_s0 = scalar_lea.sflag [#allocation4], %s2105_s28 }
 0xd0a   : > { %p2600_p11 = pneg %p2599_p10 }
 0xd0c   : > { %3267 = dma.done.wait (%p2600_p11), %s2106_s0, 128  }
 0xd0d   : > { %3269 = vsyncadd (%p2600_p11), %s2106_s0, 4294967168  ;;  %s3918_s28 = sld [smem:[#allocation38_spill]]  ;;  %s3921_s5 = smov %s3276_s26 }
 0xd0e   : > { %s3919_s25 = sld [smem:[#allocation36_spill]] }
 0xd0f   : > { %s3920_s27 = sld [smem:[#allocation39_spill]] }
 0xd13   : > { %p42_p12 = scmp.ge.s32.totalorder %s3918_s28, 4  }
 0xd14   : > { %s3922_s26 = smov %s3919_s25 }
 0xd15   :  { %44 = sbr.rel (!%p42_p12) target bundleno = 26 (0x1a), region = 211 }
 0xd1a   :  { %2112 = vsyncpa [#allocation3], 1 }
 0xd1b   :  { %2114 = vsyncpa [#allocation3 + $0x1], 1 }
 0xd1c   :  { %2115 = vsyncpa [#allocation6], 1 }
 0xd1d   :  { %2116 = vsyncpa [#allocation9], 1 }
 0xd1e   :  { %2117 = vsyncpa [#allocation12], 1 }
 0xd1f   :  { %2118 = vsyncpa [#allocation15], 1 }
 0xd20   :  { %2119 = vsyncpa [#allocation18], 1 }
 0xd21   :  { %2120 = vsyncpa [#allocation21], 1 }
 0xd22   :  { %2121 = vsyncpa [#allocation24], 1 }
 0xd23   :  { %2122 = vsyncpa [#allocation4], 1 }
 0xd24   :  { %2124 = vsyncpa [#allocation4 + $0x1], 1 }

</bundles_post_ra>
